<compile_context>
chip_gen: v7x
topology: tpu7x:2x2x1
jax: 0.10.0
libtpu: 0.0.40
codegen_flags: <defaults>
</compile_context>

<pallas_src>
import functools
import numpy as np

import jax
import jax.numpy as jnp
from jax.experimental import pallas as pl
from jax.experimental.pallas import tpu as pltpu

EMBED_DIM = 256            # prompt embedding dim (matches "(B, N, 256)" in the module docstring)
PE_DIM = EMBED_DIM // 2    # random-fourier feature dim
IMG_EMB_HW = (16, 16)      # image embedding spatial size
INPUT_IMG_SIZE = (64, 64)  # input image size (boxes / low-res masks are in these coordinates)
MASK_IN_CHANS = 16
NUM_LEARNABLE = 8
EPS_LN = 1e-6


# ----------------------------------------------------------------------------
# Box corner positional encoding (plain JAX: too tiny for a kernel launch)
# ----------------------------------------------------------------------------
def embed_boxes(p, boxes):
    B = boxes.shape[0]
    coords = boxes.reshape(B, 2, 2) + 0.5
    coords = coords / jnp.array([INPUT_IMG_SIZE[1], INPUT_IMG_SIZE[0]], jnp.float32)
    c = 2.0 * coords - 1.0                                               # (B, 2, 2)
    proj = (2.0 * np.pi) * jnp.einsum('bpc,cf->bpf', c, p['gauss'])      # (B, 2, PE_DIM)
    pe = jnp.concatenate([jnp.sin(proj), jnp.cos(proj)], axis=-1)        # (B, 2, 256)
    corner = jnp.stack([p['corner_top'], p['corner_bottom']], axis=0)    # (2, 256)
    return pe + corner[None]


# ----------------------------------------------------------------------------
# Kernel 1: fused mask downscaling
#   input is space-to-depth(4) packed: row s = final 16x16 position, col d = r*4+q (4x4 block)
#   conv1/conv2 are folded into (16,16) matmuls over this packing; conv3 (1x1) writes the
#   result channels-major so the NCHW output needs no transpose.
# ----------------------------------------------------------------------------
def _mask_downscale_kernel(x_ref, w1_ref, b1_ref, g1_ref, be1_ref,
                           w2_ref, b2_ref, g2_ref, be2_ref,
                           w3_ref, b3_ref, o_ref):
    f32 = jnp.float32
    x = x_ref[0]                                                         # (HW=256, 16)

    # conv1 (2x2/s2, 1->4 ch): output lanes ordered (sub-pos i, sub-pos j, channel c), c fastest.
    y1 = jnp.dot(x, w1_ref[...], preferred_element_type=f32) + b1_ref[...]       # (256, 16)

    # LayerNorm2d over the 4 channels of each of the 4 sub-positions: group stats via a
    # block-diagonal averaging matmul (built in-kernel from iota; no strided slicing needed).
    ii = jax.lax.broadcasted_iota(jnp.int32, (16, 16), 0)
    jj = jax.lax.broadcasted_iota(jnp.int32, (16, 16), 1)
    gavg = jnp.where((ii // 4) == (jj // 4), 0.25, 0.0).astype(f32)
    mu1 = jnp.dot(y1, gavg, preferred_element_type=f32)
    var1 = jnp.dot(jnp.square(y1 - mu1), gavg, preferred_element_type=f32)
    y1 = (y1 - mu1) * jax.lax.rsqrt(var1 + EPS_LN) * g1_ref[...] + be1_ref[...]
    # TODO(synk): jax.nn.gelu defaults to the tanh approximation; PyTorch nn.GELU uses exact erf.
    y1 = jax.nn.gelu(y1)

    # conv2 (2x2/s2, 4->16 ch): each row of y1 is exactly one conv2 patch -> (16,16) matmul.
    y2 = jnp.dot(y1, w2_ref[...], preferred_element_type=f32) + b2_ref[...]      # (256, 16)
    mu2 = jnp.mean(y2, axis=-1, keepdims=True)
    var2 = jnp.mean(jnp.square(y2 - mu2), axis=-1, keepdims=True)
    y2 = (y2 - mu2) * jax.lax.rsqrt(var2 + EPS_LN) * g2_ref[...] + be2_ref[...]
    y2 = jax.nn.gelu(y2)

    # conv3 (1x1, 16->256 ch), channels-major output (bf16 MXU operands, f32 accumulate).
    y3 = jax.lax.dot_general(w3_ref[...], y2.astype(jnp.bfloat16),
                             (((1,), (1,)), ((), ())),
                             preferred_element_type=f32)                         # (256 ch, 256 hw)
    o_ref[0] = y3 + b3_ref[...]


def mask_downscaling(p, masks):
    """Fused SAM mask_downscaling.  masks: (B, 1, 4*H, 4*W) -> (B, 256, H, W)."""
    B = masks.shape[0]
    Hf, Wf = IMG_EMB_HW
    HW = Hf * Wf
    assert masks.shape[-2] == 4 * Hf and masks.shape[-1] == 4 * Wf

    # space-to-depth(4): one fused XLA copy of a tiny tensor.
    x = (masks.reshape(B, Hf, 4, Wf, 4)
              .transpose(0, 1, 3, 2, 4)
              .reshape(B, HW, 16)).astype(jnp.float32)

    # Fold the conv weights into the packed layout (host-side, tiny, pure JAX).
    eye2 = jnp.eye(2, dtype=jnp.float32)
    w1s = p['conv1_w'][:, 0].astype(jnp.float32)                                 # (4, 2, 2) (c, kh, kw)
    w1m = jnp.einsum('ai,bj,ckl->akblijc', eye2, eye2, w1s).reshape(16, 16)
    b1 = jnp.tile(p['conv1_b'], 4).reshape(1, 16)
    g1 = jnp.tile(p['ln1_g'], 4).reshape(1, 16)
    be1 = jnp.tile(p['ln1_b'], 4).reshape(1, 16)
    w2m = p['conv2_w'].transpose(2, 3, 1, 0).reshape(16, 16).astype(jnp.float32)
    b2 = p['conv2_b'].reshape(1, 16)
    g2 = p['ln2_g'].reshape(1, 16)
    be2 = p['ln2_b'].reshape(1, 16)
    w3 = p['conv3_w'].reshape(EMBED_DIM, MASK_IN_CHANS).astype(jnp.bfloat16)
    b3 = p['conv3_b'].reshape(EMBED_DIM, 1)

    def const_spec(shape):   # full array, constant block index -> DMA'd once, not per grid step
        return pl.BlockSpec(shape, lambda b: (0,) * len(shape))

    out = pl.pallas_call(
        _mask_downscale_kernel,
        grid=(B,),
        in_specs=[
            pl.BlockSpec((1, HW, 16), lambda b: (b, 0, 0)),
            const_spec((16, 16)), const_spec((1, 16)), const_spec((1, 16)), const_spec((1, 16)),
            const_spec((16, 16)), const_spec((1, 16)), const_spec((1, 16)), const_spec((1, 16)),
            const_spec((EMBED_DIM, MASK_IN_CHANS)), const_spec((EMBED_DIM, 1)),
        ],
        out_specs=pl.BlockSpec((1, EMBED_DIM, HW), lambda b: (b, 0, 0)),
        out_shape=jax.ShapeDtypeStruct((B, EMBED_DIM, HW), jnp.float32),
        compiler_params=pltpu.CompilerParams(dimension_semantics=("parallel",)),
    )(x, w1m, b1, g1, be1, w2m, b2, g2, be2, w3, b3)
    return out.reshape(B, EMBED_DIM, Hf, Wf)


def prompt_encoder_forward(p, boxes, masks, batch_size):
    """Returns (sparse_embeddings, dense_embeddings) like SAM's PromptEncoder (points=None)."""
    sparse = jnp.zeros((batch_size, 0, EMBED_DIM), jnp.float32)
    if boxes is not None:
        sparse = jnp.concatenate([sparse, embed_boxes(p, boxes)], axis=1)
    if masks is not None:
        dense = mask_downscaling(p, masks)
    else:
        H, W = IMG_EMB_HW
        dense = jnp.broadcast_to(p['no_mask_embed'].reshape(1, EMBED_DIM, 1, 1),
                                 (batch_size, EMBED_DIM, H, W))
    return sparse, dense


# ----------------------------------------------------------------------------
# Kernel 2: fused prompt-learner (cross-attention + dense proj + mask logits + box head)
#   image embedding is consumed channels-major (D, HW); bf16 MXU operands, f32 accumulation.
# ----------------------------------------------------------------------------
def _prompt_learner_kernel(q_ref, x_ref, wq_ref, wk_ref, wv_ref, wo_ref,
                           wd_ref, wb1_ref, wb2_ref,
                           sparse_ref, dense_ref, mask_ref, boxes_ref, *, scale):
    f32 = jnp.float32
    bf16 = jnp.bfloat16
    tt = (((1,), (1,)), ((), ()))          # contract last dims of both operands, no batch dims

    Q = q_ref[0]                           # (N, D) f32 learnable queries
    Xt = x_ref[0]                          # (D, HW) bf16 image embedding, channels-major
    Qb = Q.astype(bf16)

    # cross-attention; (Q wq) wk^T is pre-contracted so the HW-sized matmuls run at M=N(=8),
    # and k/v are never materialized.
    q = jnp.dot(Qb, wq_ref[...], preferred_element_type=f32)                       # (N, D)
    qk = jax.lax.dot_general(q.astype(bf16), wk_ref[...], tt,
                             preferred_element_type=f32)                           # (N, D) = q @ wk^T
    logits = jnp.dot(qk.astype(bf16), Xt, preferred_element_type=f32) * scale      # (N, HW)
    attn = jax.nn.softmax(logits, axis=-1)                                         # f32
    av = jax.lax.dot_general(attn.astype(bf16), Xt, tt,
                             preferred_element_type=f32)                           # (N, D) = attn @ X
    ctx = jnp.dot(av.astype(bf16), wv_ref[...], preferred_element_type=f32)        # (N, D) = (attn @ X) @ wv
    out = jnp.dot(ctx.astype(bf16), wo_ref[...], preferred_element_type=f32) + Q   # residual in f32
    sparse_ref[0] = out

    # dense 1x1 projection of the image embedding, produced channels-major (D_out, HW):
    # no transpose is materialized in-kernel and none is needed host-side.
    dense_ref[0] = jax.lax.dot_general(wd_ref[...], Xt, (((0,), (0,)), ((), ())),
                                       preferred_element_type=f32)

    outb = out.astype(bf16)
    mask_ref[0] = jnp.dot(outb, Xt, preferred_element_type=f32)                    # (N, HW) mask logits

    # box MLP head; wb2 is lane-padded to 128 so the store is lane-dense.
    h = jax.nn.relu(jnp.dot(outb, wb1_ref[...], preferred_element_type=f32))
    boxes_ref[0] = jax.nn.sigmoid(
        jnp.dot(h.astype(bf16), wb2_ref[...], preferred_element_type=f32))


def prompt_learner_forward(params, image_features, queries):
    img = image_features[-1]                       # (B, D, H, W) image embedding
    B, D, H, W = img.shape
    HW = H * W
    N = queries.shape[1]

    xt = img.reshape(B, D, HW).astype(jnp.bfloat16)     # pure reshape (no transpose), bf16 halves DMA
    bf = lambda w: w.astype(jnp.bfloat16)
    wb2p = jnp.pad(params['wb2'], ((0, 0), (0, 128 - params['wb2'].shape[1])))

    def const_spec(shape):   # full array, constant block index -> weights stay resident across the grid
        return pl.BlockSpec(shape, lambda b: (0,) * len(shape))

    kernel = functools.partial(_prompt_learner_kernel, scale=1.0 / float(np.sqrt(D)))
    sparse, dense_t, maskout, boxes_p = pl.pallas_call(
        kernel,
        grid=(B,),
        in_specs=[
            pl.BlockSpec((1, N, D), lambda b: (b, 0, 0)),
            pl.BlockSpec((1, D, HW), lambda b: (b, 0, 0)),
            const_spec((D, D)), const_spec((D, D)), const_spec((D, D)), const_spec((D, D)),
            const_spec((D, D)), const_spec((D, D)), const_spec((D, 128)),
        ],
        out_specs=[
            pl.BlockSpec((1, N, D), lambda b: (b, 0, 0)),
            pl.BlockSpec((1, D, HW), lambda b: (b, 0, 0)),
            pl.BlockSpec((1, N, HW), lambda b: (b, 0, 0)),
            pl.BlockSpec((1, N, 128), lambda b: (b, 0, 0)),
        ],
        out_shape=[
            jax.ShapeDtypeStruct((B, N, D), jnp.float32),
            jax.ShapeDtypeStruct((B, D, HW), jnp.float32),
            jax.ShapeDtypeStruct((B, N, HW), jnp.float32),
            jax.ShapeDtypeStruct((B, N, 128), jnp.float32),
        ],
        compiler_params=pltpu.CompilerParams(dimension_semantics=("parallel",)),
    )(queries.astype(jnp.float32), xt,
      bf(params['wq']), bf(params['wk']), bf(params['wv']), bf(params['wo']),
      bf(params['wd']), bf(params['wb1']), bf(wb2p))

    learned_dense = dense_t.reshape(B, D, H, W)         # already channels-major -> NCHW, no transpose
    interim_mask_output = maskout.reshape(B, N, H, W)
    pred_boxes = boxes_p[:, :, :4]
    return sparse, learned_dense, interim_mask_output, pred_boxes


# ----------------------------------------------------------------------------
# PromptSampler.sample (host-side control flow, faithful to the PyTorch module)
# ----------------------------------------------------------------------------
# TODO(synk): non_zero_coordinates (data-dependent torch.nonzero + randint gather) is never
# reached in sample() since points=None; no clean Pallas equivalent, left unimplemented.
def prompt_sampler_forward(params, image_features, learnable_prompts, batch, sample_key):
    masks = batch.get('masks', None)
    assert masks is not None, 'Masks must be provided during training.'

    p = jnp.array([1.0, 0.0, 0.4, 0.2], jnp.float32)
    sampled = np.array(jax.random.bernoulli(sample_key, p))        # host-side Bernoulli draw
    if not sampled.sum() > 0:
        sampled[0] = True

    boxes = batch['boxes'] if sampled[2] else None
    _masks = batch['low_res_masks'] if sampled[3] else None
    B = learnable_prompts.shape[0]

    sparse_embeddings, mask_embeddings = prompt_encoder_forward(
        params['encoder'], boxes, _masks, B)

    learned_sparse_embeddings = jnp.zeros(
        (sparse_embeddings.shape[0], 0, sparse_embeddings.shape[2]), jnp.float32)
    learned_dense_embeddings = None
    interim_mask_output = pred_boxes = None

    if not sparse_embeddings.shape[1] > 0:
        (learned_sparse_embeddings, learned_dense_embeddings,
         interim_mask_output, pred_boxes) = prompt_learner_forward(
            params['learner'], image_features, learnable_prompts)
        output_sparse_embeddings = learned_sparse_embeddings
    elif sampled[0]:
        (learned_sparse_embeddings, learned_dense_embeddings,
         interim_mask_output, pred_boxes) = prompt_learner_forward(
            params['learner'], image_features, learnable_prompts)
        output_sparse_embeddings = jnp.concatenate(
            [learned_sparse_embeddings, sparse_embeddings], axis=1)
    else:
        output_sparse_embeddings = sparse_embeddings

    return {
        'learned_embeddings': learned_sparse_embeddings,
        'interim_mask_output': interim_mask_output,
        'pred_boxes': pred_boxes,
        'sparse_embeddings': output_sparse_embeddings,
        'dense_embeddings': mask_embeddings if learned_dense_embeddings is None
                            else learned_dense_embeddings,
    }


# ----------------------------------------------------------------------------
# Deterministic parameter init (synthetic — shapes follow SAM PromptEncoder + a
# minimal cross-attention prompt learner)
# ----------------------------------------------------------------------------
def init_params(key):
    ks = jax.random.split(key, 16)

    def nrm(k, shape, scale=0.02):
        return (scale * jax.random.normal(k, shape)).astype(jnp.float32)

    D = EMBED_DIM
    encoder = dict(
        gauss=jax.random.normal(ks[0], (2, PE_DIM)).astype(jnp.float32),
        corner_top=nrm(ks[1], (D,), 1.0),
        corner_bottom=nrm(ks[2], (D,), 1.0),
        no_mask_embed=nrm(ks[3], (D,), 1.0),
        conv1_w=nrm(ks[4], (MASK_IN_CHANS // 4, 1, 2, 2), 0.5),
        conv1_b=jnp.zeros((MASK_IN_CHANS // 4,), jnp.float32),
        ln1_g=jnp.ones((MASK_IN_CHANS // 4,), jnp.float32),
        ln1_b=jnp.zeros((MASK_IN_CHANS // 4,), jnp.float32),
        conv2_w=nrm(ks[5], (MASK_IN_CHANS, MASK_IN_CHANS // 4, 2, 2), 0.5),
        conv2_b=jnp.zeros((MASK_IN_CHANS,), jnp.float32),
        ln2_g=jnp.ones((MASK_IN_CHANS,), jnp.float32),
        ln2_b=jnp.zeros((MASK_IN_CHANS,), jnp.float32),
        conv3_w=nrm(ks[6], (D, MASK_IN_CHANS, 1, 1), 0.5),
        conv3_b=jnp.zeros((D,), jnp.float32),
    )
    learner = dict(
        wq=nrm(ks[7], (D, D)), wk=nrm(ks[8], (D, D)), wv=nrm(ks[9], (D, D)),
        wo=nrm(ks[10], (D, D)), wd=nrm(ks[11], (D, D)),
        wb1=nrm(ks[12], (D, D)), wb2=nrm(ks[13], (D, 4)),
    )
    return {'encoder': encoder, 'learner': learner}


if __name__ == "__main__":
    key = jax.random.PRNGKey(0)
    k_img, k_prompt, k_mask, k_lrm, k_param, k_sample = jax.random.split(key, 6)

    B = 2
    H, W = IMG_EMB_HW
    image_embedding = jax.random.normal(k_img, (B, EMBED_DIM, H, W), jnp.float32)
    image_features = [image_embedding]
    learnable_prompts = jax.random.normal(k_prompt, (B, NUM_LEARNABLE, EMBED_DIM), jnp.float32)

    masks = (jax.random.uniform(k_mask, (B, INPUT_IMG_SIZE[0], INPUT_IMG_SIZE[1])) > 0.5
             ).astype(jnp.float32)
    low_res_masks = (jax.random.uniform(k_lrm, (B, 1, INPUT_IMG_SIZE[0], INPUT_IMG_SIZE[1])) > 0.5
                     ).astype(jnp.float32)
    boxes = jnp.array([[8.0, 8.0, 40.0, 48.0],
                       [4.0, 12.0, 56.0, 60.0]], jnp.float32)
    batch = {'masks': masks, 'boxes': boxes, 'low_res_masks': low_res_masks}

    params = init_params(k_param)

    out = prompt_sampler_forward(params, image_features, learnable_prompts, batch, k_sample)
    jax.block_until_ready([v for v in jax.tree_util.tree_leaves(out) if v is not None])

    # Also exercise the box-PE path and the fused mask-downscaling kernel regardless of the
    # Bernoulli draw.
    sp, de = prompt_encoder_forward(params['encoder'], boxes, low_res_masks, B)
    jax.block_until_ready((sp, de))

    print("KERNEL_OK")
</pallas_src>

<mosaic_0001>
module attributes {stable_mosaic.version = 11 : i64} {
  func.func @_prompt_learner_kernel(%arg0: i32, %arg1: memref<1x8x256xf32, #tpu.memory_space<vmem>>, %arg2: memref<1x256x256xbf16, #tpu.memory_space<vmem>>, %arg3: memref<256x256xbf16, #tpu.memory_space<vmem>>, %arg4: memref<256x256xbf16, #tpu.memory_space<vmem>>, %arg5: memref<256x256xbf16, #tpu.memory_space<vmem>>, %arg6: memref<256x256xbf16, #tpu.memory_space<vmem>>, %arg7: memref<256x256xbf16, #tpu.memory_space<vmem>>, %arg8: memref<256x256xbf16, #tpu.memory_space<vmem>>, %arg9: memref<256x128xbf16, #tpu.memory_space<vmem>>, %arg10: memref<1x8x256xf32, #tpu.memory_space<vmem>>, %arg11: memref<1x256x256xf32, #tpu.memory_space<vmem>>, %arg12: memref<1x8x256xf32, #tpu.memory_space<vmem>>, %arg13: memref<1x8x128xf32, #tpu.memory_space<vmem>>) attributes {dimension_semantics = [#tpu.dimension_semantics<parallel>], iteration_bounds = array<i64: 2>, scalar_prefetch = 0 : i64, scratch_operands = 0 : i64, tpu.core_type = #tpu.core_type<tc>, window_params = [{transform_indices = @transform_0, window_bounds = array<i64: 1, 8, 256>}, {transform_indices = @transform_1, window_bounds = array<i64: 1, 256, 256>}, {pipeline_mode = #tpu.pipeline_mode<synchronous>, transform_indices = @transform_2, window_bounds = array<i64: 256, 256>}, {pipeline_mode = #tpu.pipeline_mode<synchronous>, transform_indices = @transform_3, window_bounds = array<i64: 256, 256>}, {pipeline_mode = #tpu.pipeline_mode<synchronous>, transform_indices = @transform_4, window_bounds = array<i64: 256, 256>}, {pipeline_mode = #tpu.pipeline_mode<synchronous>, transform_indices = @transform_5, window_bounds = array<i64: 256, 256>}, {pipeline_mode = #tpu.pipeline_mode<synchronous>, transform_indices = @transform_6, window_bounds = array<i64: 256, 256>}, {pipeline_mode = #tpu.pipeline_mode<synchronous>, transform_indices = @transform_7, window_bounds = array<i64: 256, 256>}, {pipeline_mode = #tpu.pipeline_mode<synchronous>, transform_indices = @transform_8, window_bounds = array<i64: 256, 128>}, {transform_indices = @transform_9, window_bounds = array<i64: 1, 8, 256>}, {transform_indices = @transform_10, window_bounds = array<i64: 1, 256, 256>}, {transform_indices = @transform_11, window_bounds = array<i64: 1, 8, 256>}, {transform_indices = @transform_12, window_bounds = array<i64: 1, 8, 128>}]} {
    %c0 = arith.constant 0 : index
    %c0_0 = arith.constant 0 : index
    %c0_1 = arith.constant 0 : index
    %0 = vector.load %arg1[%c0, %c0_0, %c0_1] : memref<1x8x256xf32, #tpu.memory_space<vmem>>, vector<1x8x256xf32>
    %1 = vector.shape_cast %0 : vector<1x8x256xf32> to vector<8x256xf32>
    %c0_2 = arith.constant 0 : index
    %c0_3 = arith.constant 0 : index
    %c0_4 = arith.constant 0 : index
    %2 = vector.load %arg2[%c0_2, %c0_3, %c0_4] : memref<1x256x256xbf16, #tpu.memory_space<vmem>>, vector<1x256x256xbf16>
    %3 = vector.shape_cast %2 : vector<1x256x256xbf16> to vector<256x256xbf16>
    %4 = arith.truncf %1 : vector<8x256xf32> to vector<8x256xbf16>
    %c0_5 = arith.constant 0 : index
    %c0_6 = arith.constant 0 : index
    %5 = vector.load %arg3[%c0_5, %c0_6] : memref<256x256xbf16, #tpu.memory_space<vmem>>, vector<256x256xbf16>
    %cst = arith.constant dense<0.000000e+00> : vector<8x256xf32>
    %6 = tpu.matmul %4, %5, %cst {dimension_numbers = #tpu.dot_dimension_numbers<[1], [0], [0], [1], [0, 0, 1, 1], [], []>} : vector<8x256xbf16>, vector<256x256xbf16>, vector<8x256xf32> -> vector<8x256xf32>
    %7 = arith.truncf %6 : vector<8x256xf32> to vector<8x256xbf16>
    %c0_7 = arith.constant 0 : index
    %c0_8 = arith.constant 0 : index
    %8 = vector.load %arg4[%c0_7, %c0_8] : memref<256x256xbf16, #tpu.memory_space<vmem>>, vector<256x256xbf16>
    %cst_9 = arith.constant dense<0.000000e+00> : vector<8x256xf32>
    %9 = tpu.matmul %7, %8, %cst_9 {dimension_numbers = #tpu.dot_dimension_numbers<[1], [1], [0], [0], [0, 0, 1, 0], [], []>} : vector<8x256xbf16>, vector<256x256xbf16>, vector<8x256xf32> -> vector<8x256xf32>
    %10 = arith.truncf %9 : vector<8x256xf32> to vector<8x256xbf16>
    %cst_10 = arith.constant dense<0.000000e+00> : vector<8x256xf32>
    %11 = tpu.matmul %10, %3, %cst_10 {dimension_numbers = #tpu.dot_dimension_numbers<[1], [0], [0], [1], [0, 0, 1, 1], [], []>} : vector<8x256xbf16>, vector<256x256xbf16>, vector<8x256xf32> -> vector<8x256xf32>
    %cst_11 = arith.constant 6.250000e-02 : f32
    %12 = vector.broadcast %cst_11 : f32 to vector<8x256xf32>
    %13 = arith.mulf %11, %12 : vector<8x256xf32>
    %cst_12 = arith.constant dense<0xFF800000> : vector<8xf32>
    %14 = vector.multi_reduction <maximumf>, %13, %cst_12 [1] : vector<8x256xf32> to vector<8xf32>
    %cst_13 = arith.constant 0xFF800000 : f32
    %15 = vector.broadcast %cst_13 : f32 to vector<8xf32>
    %16 = arith.maximumf %15, %14 : vector<8xf32>
    %17 = vector.shape_cast %16 : vector<8xf32> to vector<8x1xf32>
    %18 = vector.broadcast %17 : vector<8x1xf32> to vector<8x256xf32>
    %19 = arith.subf %13, %18 : vector<8x256xf32>
    %20 = math.exp %19 : vector<8x256xf32>
    %cst_14 = arith.constant dense<0.000000e+00> : vector<8xf32>
    %21 = vector.multi_reduction <add>, %20, %cst_14 [1] : vector<8x256xf32> to vector<8xf32>
    %22 = vector.shape_cast %21 : vector<8xf32> to vector<8x1xf32>
    %23 = vector.broadcast %22 : vector<8x1xf32> to vector<8x256xf32>
    %24 = arith.divf %20, %23 : vector<8x256xf32>
    %25 = arith.truncf %24 : vector<8x256xf32> to vector<8x256xbf16>
    %cst_15 = arith.constant dense<0.000000e+00> : vector<8x256xf32>
    %26 = tpu.matmul %25, %3, %cst_15 {dimension_numbers = #tpu.dot_dimension_numbers<[1], [1], [0], [0], [0, 0, 1, 0], [], []>} : vector<8x256xbf16>, vector<256x256xbf16>, vector<8x256xf32> -> vector<8x256xf32>
    %27 = arith.truncf %26 : vector<8x256xf32> to vector<8x256xbf16>
    %c0_16 = arith.constant 0 : index
    %c0_17 = arith.constant 0 : index
    %28 = vector.load %arg5[%c0_16, %c0_17] : memref<256x256xbf16, #tpu.memory_space<vmem>>, vector<256x256xbf16>
    %cst_18 = arith.constant dense<0.000000e+00> : vector<8x256xf32>
    %29 = tpu.matmul %27, %28, %cst_18 {dimension_numbers = #tpu.dot_dimension_numbers<[1], [0], [0], [1], [0, 0, 1, 1], [], []>} : vector<8x256xbf16>, vector<256x256xbf16>, vector<8x256xf32> -> vector<8x256xf32>
    %30 = arith.truncf %29 : vector<8x256xf32> to vector<8x256xbf16>
    %c0_19 = arith.constant 0 : index
    %c0_20 = arith.constant 0 : index
    %31 = vector.load %arg6[%c0_19, %c0_20] : memref<256x256xbf16, #tpu.memory_space<vmem>>, vector<256x256xbf16>
    %cst_21 = arith.constant dense<0.000000e+00> : vector<8x256xf32>
    %32 = tpu.matmul %30, %31, %cst_21 {dimension_numbers = #tpu.dot_dimension_numbers<[1], [0], [0], [1], [0, 0, 1, 1], [], []>} : vector<8x256xbf16>, vector<256x256xbf16>, vector<8x256xf32> -> vector<8x256xf32>
    %33 = arith.addf %32, %1 : vector<8x256xf32>
    %c0_22 = arith.constant 0 : index
    %c0_23 = arith.constant 0 : index
    %c0_24 = arith.constant 0 : index
    %34 = vector.load %arg10[%c0_22, %c0_23, %c0_24] : memref<1x8x256xf32, #tpu.memory_space<vmem>>, vector<1x8x256xf32>
    %35 = vector.shape_cast %34 : vector<1x8x256xf32> to vector<8x256xf32>
    %36 = vector.shape_cast %33 : vector<8x256xf32> to vector<1x8x256xf32>
    tpu.vector_store %arg10[%c0_22, %c0_23, %c0_24], %36 {strides = array<i32>} : memref<1x8x256xf32, #tpu.memory_space<vmem>>, vector<1x8x256xf32>,
    %c0_25 = arith.constant 0 : index
    %c0_26 = arith.constant 0 : index
    %37 = vector.load %arg7[%c0_25, %c0_26] : memref<256x256xbf16, #tpu.memory_space<vmem>>, vector<256x256xbf16>
    %cst_27 = arith.constant dense<0.000000e+00> : vector<256x256xf32>
    %38 = tpu.matmul %37, %3, %cst_27 {dimension_numbers = #tpu.dot_dimension_numbers<[0], [0], [1], [1], [0, 1, 1, 1], [], []>} : vector<256x256xbf16>, vector<256x256xbf16>, vector<256x256xf32> -> vector<256x256xf32>
    %c0_28 = arith.constant 0 : index
    %c0_29 = arith.constant 0 : index
    %c0_30 = arith.constant 0 : index
    %39 = vector.load %arg11[%c0_28, %c0_29, %c0_30] : memref<1x256x256xf32, #tpu.memory_space<vmem>>, vector<1x256x256xf32>
    %40 = vector.shape_cast %39 : vector<1x256x256xf32> to vector<256x256xf32>
    %41 = vector.shape_cast %38 : vector<256x256xf32> to vector<1x256x256xf32>
    tpu.vector_store %arg11[%c0_28, %c0_29, %c0_30], %41 {strides = array<i32>} : memref<1x256x256xf32, #tpu.memory_space<vmem>>, vector<1x256x256xf32>,
    %42 = arith.truncf %33 : vector<8x256xf32> to vector<8x256xbf16>
    %cst_31 = arith.constant dense<0.000000e+00> : vector<8x256xf32>
    %43 = tpu.matmul %42, %3, %cst_31 {dimension_numbers = #tpu.dot_dimension_numbers<[1], [0], [0], [1], [0, 0, 1, 1], [], []>} : vector<8x256xbf16>, vector<256x256xbf16>, vector<8x256xf32> -> vector<8x256xf32>
    %c0_32 = arith.constant 0 : index
    %c0_33 = arith.constant 0 : index
    %c0_34 = arith.constant 0 : index
    %44 = vector.load %arg12[%c0_32, %c0_33, %c0_34] : memref<1x8x256xf32, #tpu.memory_space<vmem>>, vector<1x8x256xf32>
    %45 = vector.shape_cast %44 : vector<1x8x256xf32> to vector<8x256xf32>
    %46 = vector.shape_cast %43 : vector<8x256xf32> to vector<1x8x256xf32>
    tpu.vector_store %arg12[%c0_32, %c0_33, %c0_34], %46 {strides = array<i32>} : memref<1x8x256xf32, #tpu.memory_space<vmem>>, vector<1x8x256xf32>,
    %c0_35 = arith.constant 0 : index
    %c0_36 = arith.constant 0 : index
    %47 = vector.load %arg8[%c0_35, %c0_36] : memref<256x256xbf16, #tpu.memory_space<vmem>>, vector<256x256xbf16>
    %cst_37 = arith.constant dense<0.000000e+00> : vector<8x256xf32>
    %48 = tpu.matmul %42, %47, %cst_37 {dimension_numbers = #tpu.dot_dimension_numbers<[1], [0], [0], [1], [0, 0, 1, 1], [], []>} : vector<8x256xbf16>, vector<256x256xbf16>, vector<8x256xf32> -> vector<8x256xf32>
    %cst_38 = arith.constant 0.000000e+00 : f32
    %49 = vector.broadcast %cst_38 : f32 to vector<8x256xf32>
    %50 = arith.maximumf %48, %49 : vector<8x256xf32>
    %51 = arith.truncf %50 : vector<8x256xf32> to vector<8x256xbf16>
    %c0_39 = arith.constant 0 : index
    %c0_40 = arith.constant 0 : index
    %52 = vector.load %arg9[%c0_39, %c0_40] : memref<256x128xbf16, #tpu.memory_space<vmem>>, vector<256x128xbf16>
    %cst_41 = arith.constant dense<0.000000e+00> : vector<8x128xf32>
    %53 = tpu.matmul %51, %52, %cst_41 {dimension_numbers = #tpu.dot_dimension_numbers<[1], [0], [0], [1], [0, 0, 1, 1], [], []>} : vector<8x256xbf16>, vector<256x128xbf16>, vector<8x128xf32> -> vector<8x128xf32>
    %54 = arith.negf %53 : vector<8x128xf32>
    %55 = math.exp %54 : vector<8x128xf32>
    %cst_42 = arith.constant 1.000000e+00 : f32
    %56 = vector.broadcast %cst_42 : f32 to vector<8x128xf32>
    %57 = arith.addf %56, %55 : vector<8x128xf32>
    %58 = arith.divf %56, %57 : vector<8x128xf32>
    %c0_43 = arith.constant 0 : index
    %c0_44 = arith.constant 0 : index
    %c0_45 = arith.constant 0 : index
    %59 = vector.load %arg13[%c0_43, %c0_44, %c0_45] : memref<1x8x128xf32, #tpu.memory_space<vmem>>, vector<1x8x128xf32>
    %60 = vector.shape_cast %59 : vector<1x8x128xf32> to vector<8x128xf32>
    %61 = vector.shape_cast %58 : vector<8x128xf32> to vector<1x8x128xf32>
    tpu.vector_store %arg13[%c0_43, %c0_44, %c0_45], %61 {strides = array<i32>} : memref<1x8x128xf32, #tpu.memory_space<vmem>>, vector<1x8x128xf32>,
    return
  }
  func.func @transform_0(%arg0: i32) -> (i32, i32, i32) {
    %c0_i32 = arith.constant 0 : i32
    %c0_i32_0 = arith.constant 0 : i32
    %c0_i32_1 = arith.constant 0 : i32
    return %arg0, %c0_i32, %c0_i32_0 : i32, i32, i32
  }
  func.func @transform_1(%arg0: i32) -> (i32, i32, i32) {
    %c0_i32 = arith.constant 0 : i32
    %c0_i32_0 = arith.constant 0 : i32
    %c0_i32_1 = arith.constant 0 : i32
    return %arg0, %c0_i32, %c0_i32_0 : i32, i32, i32
  }
  func.func @transform_2(%arg0: i32) -> (i32, i32) {
    %c0_i32 = arith.constant 0 : i32
    %c0_i32_0 = arith.constant 0 : i32
    %c0_i32_1 = arith.constant 0 : i32
    return %c0_i32, %c0_i32_0 : i32, i32
  }
  func.func @transform_3(%arg0: i32) -> (i32, i32) {
    %c0_i32 = arith.constant 0 : i32
    %c0_i32_0 = arith.constant 0 : i32
    %c0_i32_1 = arith.constant 0 : i32
    return %c0_i32, %c0_i32_0 : i32, i32
  }
  func.func @transform_4(%arg0: i32) -> (i32, i32) {
    %c0_i32 = arith.constant 0 : i32
    %c0_i32_0 = arith.constant 0 : i32
    %c0_i32_1 = arith.constant 0 : i32
    return %c0_i32, %c0_i32_0 : i32, i32
  }
  func.func @transform_5(%arg0: i32) -> (i32, i32) {
    %c0_i32 = arith.constant 0 : i32
    %c0_i32_0 = arith.constant 0 : i32
    %c0_i32_1 = arith.constant 0 : i32
    return %c0_i32, %c0_i32_0 : i32, i32
  }
  func.func @transform_6(%arg0: i32) -> (i32, i32) {
    %c0_i32 = arith.constant 0 : i32
    %c0_i32_0 = arith.constant 0 : i32
    %c0_i32_1 = arith.constant 0 : i32
    return %c0_i32, %c0_i32_0 : i32, i32
  }
  func.func @transform_7(%arg0: i32) -> (i32, i32) {
    %c0_i32 = arith.constant 0 : i32
    %c0_i32_0 = arith.constant 0 : i32
    %c0_i32_1 = arith.constant 0 : i32
    return %c0_i32, %c0_i32_0 : i32, i32
  }
  func.func @transform_8(%arg0: i32) -> (i32, i32) {
    %c0_i32 = arith.constant 0 : i32
    %c0_i32_0 = arith.constant 0 : i32
    %c0_i32_1 = arith.constant 0 : i32
    return %c0_i32, %c0_i32_0 : i32, i32
  }
  func.func @transform_9(%arg0: i32) -> (i32, i32, i32) {
    %c0_i32 = arith.constant 0 : i32
    %c0_i32_0 = arith.constant 0 : i32
    %c0_i32_1 = arith.constant 0 : i32
    return %arg0, %c0_i32, %c0_i32_0 : i32, i32, i32
  }
  func.func @transform_10(%arg0: i32) -> (i32, i32, i32) {
    %c0_i32 = arith.constant 0 : i32
    %c0_i32_0 = arith.constant 0 : i32
    %c0_i32_1 = arith.constant 0 : i32
    return %arg0, %c0_i32, %c0_i32_0 : i32, i32, i32
  }
  func.func @transform_11(%arg0: i32) -> (i32, i32, i32) {
    %c0_i32 = arith.constant 0 : i32
    %c0_i32_0 = arith.constant 0 : i32
    %c0_i32_1 = arith.constant 0 : i32
    return %arg0, %c0_i32, %c0_i32_0 : i32, i32, i32
  }
  func.func @transform_12(%arg0: i32) -> (i32, i32, i32) {
    %c0_i32 = arith.constant 0 : i32
    %c0_i32_0 = arith.constant 0 : i32
    %c0_i32_1 = arith.constant 0 : i32
    return %arg0, %c0_i32, %c0_i32_0 : i32, i32, i32
  }
}

</mosaic_0001>

<bundles_post_ra>
// kernel: tpu_custom_call.1
= control target key start
LH: loop header
LB: loop body
LE: loop exit
PB: predicated region body
PF: predicated region fallthrough
CT: control target
= control target key end

     0   :  { %s5297_s0 = inlined_call_operand.hbm [shape: f32[2,8,256], index: 0, kind: input, shape index: {}]   ;;  %s5298_s1 = inlined_call_operand.hbm [shape: bf16[2,256,256], index: 1, kind: input, shape index: {}]   ;;  %s5299_s2 = inlined_call_operand.hbm [shape: bf16[256,256], index: 2, kind: input, shape index: {}]   ;;  %s5300_s3 = inlined_call_operand.hbm [shape: bf16[256,256], index: 3, kind: input, shape index: {}]   ;;  %s5301_s4 = inlined_call_operand.hbm [shape: bf16[256,256], index: 4, kind: input, shape index: {}]   ;;  %s5302_s5 = inlined_call_operand.hbm [shape: bf16[256,256], index: 5, kind: input, shape index: {}]   ;;  %s5303_s6 = inlined_call_operand.hbm [shape: bf16[256,256], index: 6, kind: input, shape index: {}]   ;;  %s5304_s7 = inlined_call_operand.hbm [shape: bf16[256,256], index: 7, kind: input, shape index: {}]   ;;  %s5305_s8 = inlined_call_operand.hbm [shape: bf16[256,128], index: 8, kind: input, shape index: {}]   ;;  %s5306_s9 = inlined_call_operand.hbm [shape: f32[2,8,256], index: 9, kind: output, shape index: {0}]   ;;  %s5307_s10 = inlined_call_operand.hbm [shape: f32[2,256,256], index: 10, kind: output, shape index: {1}]   ;;  %s5308_s11 = inlined_call_operand.hbm [shape: f32[2,8,256], index: 11, kind: output, shape index: {2}]   ;;  %s5309_s12 = inlined_call_operand.hbm [shape: f32[2,8,128], index: 12, kind: output, shape index: {3}]  }
   0x1   :  { %5320 = sst [smem:[#allocation32_spill]] %s5297_s0 }
   0x2   :  { %5321 = sst [smem:[#allocation33_spill]] %s5298_s1 }
   0x3   :  { %5322 = sst [smem:[#allocation34_spill]] %s5299_s2 }
   0x4   :  { %5323 = sst [smem:[#allocation35_spill]] %s5300_s3 }
   0x5   :  { %5324 = sst [smem:[#allocation36_spill]] %s5301_s4 }
   0x6   :  { %5325 = sst [smem:[#allocation37_spill]] %s5302_s5 }
   0x7   :  { %5326 = sst [smem:[#allocation38_spill]] %s5303_s6 }
   0x8   :  { %5327 = sst [smem:[#allocation39_spill]] %s5306_s9 }
   0x9   :  { %5328 = sst [smem:[#allocation40_spill]] %s5307_s10 }
   0xa   :  { %5329 = sst [smem:[#allocation41_spill]] %s5308_s11 }
   0xb   :  { %5330 = sst [smem:[#allocation42_spill]] %s5309_s12 }
   0xc   :  { %18 = vsyncpa [#allocation3], 0 }
   0xd   :  { %20 = vsyncpa [#allocation3 + $0x1], 0 }
   0xe   :  { %21 = vsyncpa [#allocation6], 0 }
   0xf   :  { %23 = vsyncpa [#allocation6 + $0x1], 0 }
  0x10   :  { %24 = vsyncpa [#allocation9], 0 }
  0x11   :  { %25 = vsyncpa [#allocation12], 0 }
  0x12   :  { %26 = vsyncpa [#allocation15], 0 }
  0x13   :  { %27 = vsyncpa [#allocation4], 0 }
  0x14   :  { %29 = vsyncpa [#allocation4 + $0x1], 0 }
  0x15   :  { %30 = vsyncpa [#allocation19], 0 }
  0x16   :  { %32 = vsyncpa [#allocation19 + $0x1], 0 }
  0x17   :  { %33 = vsyncpa [#allocation22], 0 }
  0x18   :  { %35 = vsyncpa [#allocation22 + $0x1], 0  ;;  %s4472_s21 = smov 0   ;;  %s4474_s22 = smov 0  }
  0x19   :  { %s4476_s23 = smov 0   ;;  %s4478_s24 = smov 0  }
  0x1a LB: > { %s4388_s25 = smov [#allocation7]   ;;  %s4493_s27 = sadd.s32 4294967295, %s4386_s24   ;;  %s4386_s24 = sphi %s4478_s24, %s5369_s24   ;;  %s4382_s23 = sphi %s4476_s23, %s5368_s23   ;;  %s4378_s22 = sphi %s4474_s22, %s5367_s22   ;;  %s4374_s21 = sphi %s4472_s21, %s5366_s21  }
  0x1b   : > { %s361_s26 = sshll.u32 %s4388_s25, 4  ;;  %p3135_p0 = scmp.ge.s32.totalorder %s4386_s24, 1  ;;  %s4498_s26 = int_to_ptr.vmem [resolvable:$true] %s361_s26 }
  0x1c   : > { %p5314_p1 = scmp.eq.s32.totalorder %s4493_s27, 0  ;;  %p349_p2 = scmp.lt.s32.totalorder %s4386_s24, 3 }
  0x1d   : > { %s4389_s29 = smov [#allocation8]   ;;  %s4390_s14 = smov [#allocation11]  }
  0x1e   : > { %p4500_p3 = pnand %p3135_p0, %p349_p2  ;;  %s374_s30 = sshll.u32 %s4389_s29, 4  ;;  %s4513_s30 = int_to_ptr.vmem [resolvable:$true] %s374_s30 }
  0x1f   : > { %s400_s15 = sshll.u32 %s4390_s14, 4  ;;  %s5333_s2 = sld [smem:[#allocation34_spill]]  ;;  %s4515_s15 = int_to_ptr.vmem [resolvable:$true] %s400_s15 }
  0x20   : > { %s5331_s28 = scalar_select %p4500_p3, 1, 0 }
  0x21   : > { %p3485_p5 = pneg %p4500_p3 }
  0x23   : > { %p4509_p6 = pnand %p3485_p5, %p5314_p1 }
  0x25   : > { %s3952_s18 = scalar_lea.hbm %s5333_s2, 4096  ;;  %p4525_p8 = pneg %p4509_p6 }
  0x26   : > { %p3953_p7 = scmp.ne.s32.totalorder %s5333_s2, %s3952_s18  ;;  %p3959_p11 = scmp.lt.u32.totalorder %s3952_s18, %s5333_s2 }
  0x28   : > { %p3955_p9 = pnand %p4525_p8, %p3953_p7 }
  0x2a   : > { %p3956_p10 = pneg %p3955_p9 }
  0x2c   : > { %p3961_p12 = pnand %p3959_p11, %p3956_p10 }
  0x2e   : > { %3964 = shalt.err (!%p3961_p12)
}
  0x2f   : > { %s3965_s16 = scalar_lea.vmem %s4498_s26, 4096  ;;  %p3973_p5 = scmp.lt.s32.totalorder %s4498_s26, %s4498_s26 }
  0x30   : > { %p3966_p13 = scmp.ne.s32.totalorder %s4498_s26, %s3965_s16  ;;  %p3974_p4 = scmp.lt.s32.totalorder %s3965_s16, %s3965_s16 }
  0x32   : > { %p3968_p0 = pnand %p3966_p13, %p4525_p8  ;;  %p3975_p7 = por %p3974_p4, %p3973_p5 }
  0x34   : > { %p3969_p2 = pneg %p3968_p0 }
  0x36   : > { %p3976_p9 = pnand %p3975_p7, %p3969_p2 }
  0x38   : > { %3979 = shalt.err (!%p3976_p9)
}
  0x39   : > { %s5317_s17 = smov 128   ;;  %s5318_s18 = smov 8  }
  0x3a   : > { %3488 = dma.hbm_to_vmem [thread:$0]  (!%p4509_p6), %s5333_s2, 4096, %s4498_s26, [#allocation6], %s5317_s17, %s5317_s17, %s5318_s18  }
  0x3b   : > { %s5335_s3 = sld [smem:[#allocation35_spill]] }
  0x41   : > { %s3980_s16 = scalar_lea.hbm %s5335_s3, 4096 }
  0x42   : > { %p3981_p4 = scmp.ne.s32.totalorder %s5335_s3, %s3980_s16  ;;  %p3987_p12 = scmp.lt.u32.totalorder %s3980_s16, %s5335_s3 }
  0x44   : > { %p3983_p10 = pnand %p3981_p4, %p4525_p8 }
  0x46   : > { %p3984_p11 = pneg %p3983_p10 }
  0x48   : > { %p3989_p13 = pnand %p3987_p12, %p3984_p11 }
  0x4a   : > { %3992 = shalt.err (!%p3989_p13)
}
  0x4b   : > { %s3993_s26 = scalar_lea.vmem %s4513_s30, 4096  ;;  %p4001_p7 = scmp.lt.s32.totalorder %s4513_s30, %s4513_s30 }
  0x4c   : > { %p3994_p0 = scmp.ne.s32.totalorder %s4513_s30, %s3993_s26  ;;  %p4002_p9 = scmp.lt.s32.totalorder %s3993_s26, %s3993_s26 }
  0x4e   : > { %p3996_p2 = pnand %p3994_p0, %p4525_p8  ;;  %p4003_p4 = por %p4002_p9, %p4001_p7 }
  0x50   : > { %p3997_p5 = pneg %p3996_p2 }
  0x52   : > { %p4004_p10 = pnand %p4003_p4, %p3997_p5 }
  0x54   : > { %4007 = shalt.err (!%p4004_p10)
}
  0x55   : > { %3491 = dma.hbm_to_vmem [thread:$0]  (!%p4509_p6), %s5335_s3, 4096, %s4513_s30, [#allocation9], %s5317_s17, %s5317_s17, %s5318_s18  }
  0x56   : > { %s5336_s5 = sld [smem:[#allocation37_spill]] }
  0x5c   : > { %s4008_s19 = scalar_lea.hbm %s5336_s5, 4096 }
  0x5d   : > { %p4009_p11 = scmp.ne.s32.totalorder %s5336_s5, %s4008_s19  ;;  %p4015_p0 = scmp.lt.u32.totalorder %s4008_s19, %s5336_s5 }
  0x5f   : > { %p4011_p12 = pnand %p4009_p11, %p4525_p8 }
  0x61   : > { %p4012_p13 = pneg %p4011_p12 }
  0x63   : > { %p4017_p2 = pnand %p4015_p0, %p4012_p13 }
  0x65   : > { %4020 = shalt.err (!%p4017_p2)
}
  0x66   : > { %s4021_s30 = scalar_lea.vmem %s4515_s15, 4096  ;;  %p4029_p4 = scmp.lt.s32.totalorder %s4515_s15, %s4515_s15 }
  0x67   : > { %p4022_p5 = scmp.ne.s32.totalorder %s4515_s15, %s4021_s30  ;;  %p4030_p10 = scmp.lt.s32.totalorder %s4021_s30, %s4021_s30 }
  0x69   : > { %p4024_p7 = pnand %p4022_p5, %p4525_p8  ;;  %p4031_p11 = por %p4030_p10, %p4029_p4 }
  0x6b   : > { %p4025_p9 = pneg %p4024_p7 }
  0x6d   : > { %p4032_p12 = pnand %p4031_p11, %p4025_p9 }
  0x6f   : > { %4035 = shalt.err (!%p4032_p12)
}
  0x70   : > { %3497 = dma.hbm_to_vmem [thread:$0]  (!%p4509_p6), %s5336_s5, 4096, %s4515_s15, [#allocation12], %s5317_s17, %s5317_s17, %s5318_s18  }
  0x71   : > { %s4393_s10 = smov [#allocation14]   ;;  %s4394_s12 = smov [#allocation10]  }
  0x72   : > { %s426_s11 = sshll.u32 %s4393_s10, 4  ;;  %s387_s19 = sshll.u32 %s4394_s12, 4  ;;  %s427_s11 = int_to_ptr.vmem [resolvable:$true] %s426_s11  ;;  %s388_s19 = int_to_ptr.vmem [resolvable:$true] %s387_s19 }
  0x73   : > { %s4036_s14 = scalar_lea.hbm %s5304_s7, 4096 }
  0x74   : > { %p4037_p13 = scmp.ne.s32.totalorder %s5304_s7, %s4036_s14  ;;  %p4043_p5 = scmp.lt.u32.totalorder %s4036_s14, %s5304_s7 }
  0x76   : > { %p4039_p0 = pnand %p4037_p13, %p4525_p8 }
  0x78   : > { %p4040_p2 = pneg %p4039_p0 }
  0x7a   : > { %p4045_p7 = pnand %p4043_p5, %p4040_p2 }
  0x7c   : > { %4048 = shalt.err (!%p4045_p7)
}
  0x7d   : > { %s4049_s15 = scalar_lea.vmem %s427_s11, 4096  ;;  %p4057_p11 = scmp.lt.s32.totalorder %s427_s11, %s427_s11 }
  0x7e   : > { %p4050_p9 = scmp.ne.s32.totalorder %s427_s11, %s4049_s15  ;;  %p4058_p12 = scmp.lt.s32.totalorder %s4049_s15, %s4049_s15 }
  0x80   : > { %p4052_p4 = pnand %p4050_p9, %p4525_p8  ;;  %p4059_p1 = por %p4058_p12, %p4057_p11 }
  0x82   : > { %p4053_p10 = pneg %p4052_p4 }
  0x84   : > { %p4060_p3 = pnand %p4059_p1, %p4053_p10 }
  0x86   : > { %4063 = shalt.err (!%p4060_p3)
}
  0x87   : > { %3503 = dma.hbm_to_vmem [thread:$0]  (!%p4509_p6), %s5304_s7, 4096, %s427_s11, [#allocation15], %s5317_s17, %s5317_s17, %s5318_s18  }
  0x88   : > { %s5337_s4 = sld [smem:[#allocation36_spill]] }
  0x8e   : > { %s4064_s20 = scalar_lea.hbm %s5337_s4, 4096 }
  0x8f   : > { %p4065_p1 = scmp.ne.s32.totalorder %s5337_s4, %s4064_s20  ;;  %p4071_p0 = scmp.lt.u32.totalorder %s4064_s20, %s5337_s4 }
  0x91   : > { %p4067_p3 = pnand %p4065_p1, %p4525_p8 }
  0x93   : > { %p4068_p13 = pneg %p4067_p3 }
  0x95   : > { %p4073_p2 = pnand %p4071_p0, %p4068_p13 }
  0x97   : > { %4076 = shalt.err (!%p4073_p2)
}
  0x98   : > { %s4077_s26 = scalar_lea.vmem %s388_s19, 4096  ;;  %p4085_p4 = scmp.lt.s32.totalorder %s388_s19, %s388_s19 }
  0x99   : > { %p4078_p5 = scmp.ne.s32.totalorder %s388_s19, %s4077_s26  ;;  %p4086_p10 = scmp.lt.s32.totalorder %s4077_s26, %s4077_s26 }
  0x9b   : > { %p4080_p7 = pnand %p4078_p5, %p4525_p8  ;;  %p4087_p11 = por %p4086_p10, %p4085_p4 }
  0x9d   : > { %p4081_p9 = pneg %p4080_p7 }
  0x9f   : > { %p4088_p12 = pnand %p4087_p11, %p4081_p9 }
  0xa1   : > { %4091 = shalt.err (!%p4088_p12)
}
  0xa2   : > { %3494 = dma.hbm_to_vmem [thread:$0]  (!%p4509_p6), %s5337_s4, 4096, %s388_s19, [#allocation9], %s5317_s17, %s5317_s17, %s5318_s18  }
  0xa3   : > { %s4395_s2 = smov [#allocation13]   ;;  %s4396_s10 = smov [#allocation16]  }
  0xa4   : > { %s413_s9 = sshll.u32 %s4395_s2, 4  ;;  %s439_s12 = sshll.u32 %s4396_s10, 4  ;;  %s414_s9 = int_to_ptr.vmem [resolvable:$true] %s413_s9  ;;  %s440_s12 = int_to_ptr.vmem [resolvable:$true] %s439_s12 }
  0xa5   : > { %s5338_s6 = sld [smem:[#allocation38_spill]] }
  0xab   : > { %s4092_s14 = scalar_lea.hbm %s5338_s6, 4096 }
  0xac   : > { %p4093_p1 = scmp.ne.s32.totalorder %s5338_s6, %s4092_s14  ;;  %p4099_p0 = scmp.lt.u32.totalorder %s4092_s14, %s5338_s6 }
  0xae   : > { %p4095_p3 = pnand %p4093_p1, %p4525_p8 }
  0xb0   : > { %p4096_p13 = pneg %p4095_p3 }
  0xb2   : > { %p4101_p2 = pnand %p4099_p0, %p4096_p13 }
  0xb4   : > { %4104 = shalt.err (!%p4101_p2)
}
  0xb5   : > { %s4105_s19 = scalar_lea.vmem %s414_s9, 4096  ;;  %p4113_p4 = scmp.lt.s32.totalorder %s414_s9, %s414_s9 }
  0xb6   : > { %p4106_p5 = scmp.ne.s32.totalorder %s414_s9, %s4105_s19  ;;  %p4114_p10 = scmp.lt.s32.totalorder %s4105_s19, %s4105_s19 }
  0xb8   : > { %p4108_p7 = pnand %p4106_p5, %p4525_p8  ;;  %p4115_p11 = por %p4114_p10, %p4113_p4 }
  0xba   : > { %p4109_p9 = pneg %p4108_p7 }
  0xbc   : > { %p4116_p12 = pnand %p4115_p11, %p4109_p9 }
  0xbe   : > { %4119 = shalt.err (!%p4116_p12)
}
  0xbf   : > { %3500 = dma.hbm_to_vmem [thread:$0]  (!%p4509_p6), %s5338_s6, 4096, %s414_s9, [#allocation12], %s5317_s17, %s5317_s17, %s5318_s18  }
  0xc0   : > { %s4120_s29 = scalar_lea.hbm %s5305_s8, 2048 }
  0xc1   : > { %p4121_p1 = scmp.ne.s32.totalorder %s5305_s8, %s4120_s29  ;;  %p4127_p0 = scmp.lt.u32.totalorder %s4120_s29, %s5305_s8 }
  0xc3   : > { %p4123_p3 = pnand %p4121_p1, %p4525_p8 }
  0xc5   : > { %p4124_p13 = pneg %p4123_p3 }
  0xc7   : > { %p4129_p2 = pnand %p4127_p0, %p4124_p13 }
  0xc9   : > { %4132 = shalt.err (!%p4129_p2)
}
  0xca   : > { %s4133_s11 = scalar_lea.vmem %s440_s12, 2048  ;;  %p4141_p4 = scmp.lt.s32.totalorder %s440_s12, %s440_s12 }
  0xcb   : > { %p4134_p5 = scmp.ne.s32.totalorder %s440_s12, %s4133_s11  ;;  %p4142_p10 = scmp.lt.s32.totalorder %s4133_s11, %s4133_s11 }
  0xcd   : > { %p4136_p7 = pnand %p4134_p5, %p4525_p8  ;;  %p4143_p11 = por %p4142_p10, %p4141_p4 }
  0xcf   : > { %p4137_p9 = pneg %p4136_p7 }
  0xd1   : > { %p4144_p12 = pnand %p4143_p11, %p4137_p9 }
  0xd3   : > { %4147 = shalt.err (!%p4144_p12)
}
  0xd4   : > { %s4397_s9 = smov 64   ;;  %s4398_s25 = smov 4  }
  0xd5   : > { %3506 = dma.hbm_to_vmem [thread:$0]  (!%p4509_p6), %s5305_s8, 2048, %s440_s12, [#allocation15], %s4397_s9, %s4397_s9, %s4398_s25  }
  0xd6   : > { %s5316_s2 = sadd.s32 4294967294, %s4386_s24   ;;  %s4684_s10 = sadd.s32 1, %s4386_s24  }
  0xd7   : > { %s48_s20 = sadd.s32 1, %s4382_s23  ;;  %s45_s29 = ssub.s32 %s4386_s24, %s4684_s10 }
  0xd8   : > { %p55_p8 = scmp.ne.s32.totalorder %s4382_s23, %s4378_s22  ;;  %p46_p1 = scmp.eq.s32.totalorder %s45_s29, 0 }
  0xd9   : > { %p56_p3 = scmp.eq.s32.totalorder %s4386_s24, 0  ;;  %p61_p13 = scmp.ne.s32.totalorder %s4378_s22, %s4374_s21 }
  0xda   : > { %p258_p0 = scmp.eq.s32.totalorder %s4493_s27, 1  ;;  %p5339_p5 = scmp.eq.s32.totalorder %s4493_s27, 0 }
  0xdb   : > { %s4696_s14 = scalar_select %p46_p1, %s4382_s23, %s48_s20  }
  0xdc   : > { %p57_p2 = por %p56_p3, %p55_p8  ;;  %p4700_p7 = por %p5339_p5, %p61_p13 }
  0xdd   : > { %p4704_p6 = por %p258_p0, %p55_p8  ;;  %p264_p9 = scmp.eq.s32.totalorder %s5316_s2, 1 }
  0xde   : > { %p3534_p4 = scmp.lt.s32.totalorder %s4386_s24, 2  ;;  %s4712_s16 = sand.u32 1, %s4382_s23  }
  0xdf   : > { %s5341_s12 = scalar_select %p4704_p6, 1, 0 }
  0xe0   : > { %p4714_p10 = por %p264_p9, %p61_p13  ;;  %s3144_s26 = sshll.u32 %s4712_s16, 4 }
  0xe1   : > { %s3418_s11 = sshll.u32 %s4386_s24, 8  ;;  %s5343_s0 = sld [smem:[#allocation32_spill]] }
  0xe2   : > { %s5342_s30 = scalar_select %p4714_p10, 1, 0 }
  0xe3   : > { %s457_s15 = scalar_lea.vmem [#allocation2], %s3144_s26  ;;  %p4725_p11 = pnand %p3534_p4, %p57_p2 }
  0xe4   : > { %s465_s20 = sshll.u32 %s457_s15, 4  ;;  %s454_s17 = scalar_lea.sflag [#allocation3], %s4712_s16  ;;  %s4729_s20 = int_to_ptr.vmem [resolvable:$true] %s465_s20 }
  0xe5   : > { %p4150_p8 = pneg %p4725_p11 }
  0xe7   : > { %s4723_s19 = scalar_lea.hbm %s5343_s0, %s3418_s11  ;;  %s4153_s9 = scalar_lea.hbm %s5343_s0, 512 }
  0xe8   : > { %s4148_s18 = scalar_lea.hbm %s4723_s19, 256  ;;  %p4154_p13 = scmp.lt.u32.totalorder %s4723_s19, %s5343_s0 }
  0xe9   : > { %p4149_p12 = scmp.ne.s32.totalorder %s4723_s19, %s4148_s18  ;;  %p4155_p0 = scmp.lt.u32.totalorder %s4153_s9, %s4148_s18 }
  0xea   : > { %p4157_p5 = scmp.lt.u32.totalorder %s4148_s18, %s4723_s19 }
  0xeb   : > { %p4151_p1 = pnand %p4150_p8, %p4149_p12  ;;  %p4156_p2 = por %p4155_p0, %p4154_p13 }
  0xed   : > { %p4152_p3 = pneg %p4151_p1  ;;  %p4158_p9 = por %p4157_p5, %p4156_p2 }
  0xef   : > { %p4159_p4 = pnand %p4158_p9, %p4152_p3 }
  0xf1   : > { %4162 = shalt.err (!%p4159_p4)
}
  0xf2   : > { %s4163_s2 = scalar_lea.vmem %s4729_s20, 256  ;;  %s4399_s26 = smov [#allocation2]  }
  0xf3   : > { %p4164_p12 = scmp.ne.s32.totalorder %s4729_s20, %s4163_s2  ;;  %s4168_s11 = sshll.u32 %s4399_s26, 4  ;;  %s4169_s11 = int_to_ptr.vmem [resolvable:$false] %s4168_s11 }
  0xf4   : > { %s4170_s25 = scalar_lea.vmem %s4169_s11, 512  ;;  %p4171_p6 = scmp.lt.s32.totalorder %s4729_s20, %s4169_s11 }
  0xf5   : > { %p4166_p1 = pnand %p4164_p12, %p4150_p8  ;;  %p4172_p13 = scmp.lt.s32.totalorder %s4170_s25, %s4163_s2 }
  0xf7   : > { %p4167_p10 = pneg %p4166_p1  ;;  %p4173_p0 = por %p4172_p13, %p4171_p6 }
  0xf9   : > { %p4174_p2 = pnand %p4173_p0, %p4167_p10 }
  0xfb   : > { %4177 = shalt.err (!%p4174_p2)
}
  0xfc   : > { %3510 = dma.hbm_to_vmem [thread:$0]  (!%p4725_p11), %s4723_s19, 256, %s4729_s20, %s454_s17  }
  0xfd   : > { %s5345_s18 = sshll.u32 %s4712_s16, 8  ;;  %s472_s26 = sand.u32 1, %s4386_s24  }
  0xfe   : > { %s476_s9 = scalar_lea.vmem [#allocation5], %s5345_s18  ;;  %s3419_s11 = sshll.u32 %s4386_s24, 12 }
  0xff   : > { %s483_s15 = sshll.u32 %s476_s9, 4  ;;  %s5346_s1 = sld [smem:[#allocation33_spill]]  ;;  %s4761_s15 = int_to_ptr.vmem [resolvable:$true] %s483_s15 }
 0x100   : > { %s4769_s3 = scalar_lea.sflag [#allocation6], %s472_s26 }
 0x105   : > { %s4767_s0 = scalar_lea.hbm %s5346_s1, %s3419_s11  ;;  %s4183_s19 = scalar_lea.hbm %s5346_s1, 8192 }
 0x106   : > { %s4178_s4 = scalar_lea.hbm %s4767_s0, 4096  ;;  %p4184_p5 = scmp.lt.u32.totalorder %s4767_s0, %s5346_s1 }
 0x107   : > { %p4179_p6 = scmp.ne.s32.totalorder %s4767_s0, %s4178_s4  ;;  %p4185_p9 = scmp.lt.u32.totalorder %s4183_s19, %s4178_s4 }
 0x108   : > { %p4187_p12 = scmp.lt.u32.totalorder %s4178_s4, %s4767_s0 }
 0x109   : > { %p4181_p10 = pnand %p4179_p6, %p4150_p8  ;;  %p4186_p4 = por %p4185_p9, %p4184_p5 }
 0x10b   : > { %p4182_p3 = pneg %p4181_p10  ;;  %p4188_p1 = por %p4187_p12, %p4186_p4 }
 0x10d   : > { %p4189_p13 = pnand %p4188_p1, %p4182_p3 }
 0x10f   : > { %4192 = shalt.err (!%p4189_p13)
}
 0x110   : > { %s4193_s9 = scalar_lea.vmem %s4761_s15, 4096  ;;  %s4400_s26 = smov [#allocation5]  }
 0x111   : > { %p4194_p0 = scmp.ne.s32.totalorder %s4761_s15, %s4193_s9  ;;  %s4198_s11 = sshll.u32 %s4400_s26, 4  ;;  %s4199_s11 = int_to_ptr.vmem [resolvable:$false] %s4198_s11 }
 0x112   : > { %s4200_s2 = scalar_lea.vmem %s4199_s11, 8192  ;;  %p4201_p10 = scmp.lt.s32.totalorder %s4761_s15, %s4199_s11 }
 0x113   : > { %p4196_p2 = pnand %p4194_p0, %p4150_p8  ;;  %p4202_p5 = scmp.lt.s32.totalorder %s4200_s2, %s4193_s9 }
 0x115   : > { %p4197_p6 = pneg %p4196_p2  ;;  %p4203_p9 = por %p4202_p5, %p4201_p10 }
 0x117   : > { %p4204_p4 = pnand %p4203_p9, %p4197_p6 }
 0x119   : > { %4207 = shalt.err (!%p4204_p4)
}
 0x11a   : > { %s5347_s4 = smov 8   ;;  %s5348_s25 = smov 128  }
 0x11b   : > { %3513 = dma.hbm_to_vmem [thread:$0]  (!%p4725_p11), %s4767_s0, 4096, %s4761_s15, %s4769_s3, %s5348_s25, %s5348_s25, %s5347_s4  }
 0x11c   : > { %p5349_p8 = scmp.ne.s32.totalorder %s5331_s28, 0 }
 0x11d   : > { %s4801_s17 = sand.u32 (!%p5349_p8), 1, %s4378_s22  }
 0x11e   : > { %495 = sbr.rel (%p5349_p8) target bundleno = 2529 (0x9e1), region = 56  ;;  %s4804_s16 = sshll.u32 (!%p5349_p8), %s4801_s17, 4 }
 0x11f   : > { %s498_s29 = scalar_lea.sflag (!%p5349_p8), [#allocation3], %s4801_s17  ;;  %s4808_s19 = scalar_lea.vmem (!%p5349_p8), [#allocation2], %s4804_s16 }
 0x125   : > { %4337 = dma.done.wait (%p4700_p7), %s498_s29, 256  }
 0x126   : > { %4339 = vsyncadd (%p4700_p7), %s498_s29, 4294967040  ;;  %s506_s0 = sand.u32 1, %s4493_s27   ;;  %s3152_s3 = sshll.u32 %s4801_s17, 8 }
 0x127   : > { %s507_s28 = scalar_lea.sflag [#allocation6], %s506_s0  ;;  %s4818_s15 = scalar_lea.vmem [#allocation5], %s3152_s3 }
 0x128   : > { %4341 = dma.done.wait (%p4700_p7), %s507_s28, 4096  }
 0x129   : > { %4343 = vsyncadd (%p4700_p7), %s507_s28, 4294963200  ;;  %p5350_p11 = scmp.eq.s32.totalorder %s4493_s27, 0 }
 0x12b   : > { %4345 = dma.done.wait (%p5350_p11), [#allocation6], 4096   ;;  %p5351_p3 = pmov %p5350_p11 }
 0x12d   : > { %4347 = vsyncadd (%p5351_p3), [#allocation6], 4294963200  ;;  %p5352_p12 = pmov %p5351_p3 }
 0x12e   : > { %p5353_p1 = pmov %p5351_p3 }
 0x12f   : > { %4349 = dma.done.wait (%p5352_p12), [#allocation9], 8192  }
 0x130   : > { %4351 = vsyncadd (%p5353_p1), [#allocation9], 4294959104  ;;  %p5354_p13 = pmov %p5353_p1 }
 0x131   : > { %p5355_p0 = pmov %p5353_p1 }
 0x132   : > { %4353 = dma.done.wait (%p5354_p13), [#allocation12], 8192  }
 0x133   : > { %4355 = vsyncadd (%p5355_p0), [#allocation12], 4294959104  ;;  %p5356_p7 = pmov %p5355_p0 }
 0x134   : > { %p5357_p2 = pmov %p5355_p0 }
 0x135   : > { %4357 = dma.done.wait (%p5356_p7), [#allocation15], 6144  }
 0x136   : > { %4359 = vsyncadd (%p5357_p2), [#allocation15], 4294961152  ;;  %v3588_v0 = vld [vmem:[#allocation7 + $0x4] ss:$8 sps:$4 sm:$0xff]   ;;  %v3590_v1 = vld [vmem:[#allocation7] ss:$8 sps:$4 sm:$0xff]  }
 0x137   : > { %828 = vmatprep.subr.bf16.mxu0 %v3588_v0  ;;  %v3591_v2 = vld [vmem:[#allocation7 + $0x14] ss:$8 sps:$4 sm:$0xff]   ;;  %v3593_v3 = vld [vmem:[#allocation7 + $0x10] ss:$8 sps:$4 sm:$0xff]   ;;  %v3594_v4 = vld [vmem:[#allocation7 + $0x24] ss:$8 sps:$4 sm:$0xff]  }
 0x138   : > { %829 = vmatpush1.bf16.msra.mxu0 %v3590_v1  ;;  %v3596_v5 = vld [vmem:[#allocation7 + $0x20] ss:$8 sps:$4 sm:$0xff]   ;;  %v3597_v6 = vld [vmem:[#allocation7 + $0x34] ss:$8 sps:$4 sm:$0xff]   ;;  %v3599_v7 = vld [vmem:[#allocation7 + $0x30] ss:$8 sps:$4 sm:$0xff]  }
 0x139   : > { %830 = vmatprep.subr.bf16.mxu0 %v3591_v2  ;;  %v3600_v8 = vld [vmem:[#allocation7 + $0x44] ss:$8 sps:$4 sm:$0xff]   ;;  %v3602_v9 = vld [vmem:[#allocation7 + $0x40] ss:$8 sps:$4 sm:$0xff]   ;;  %v3603_v10 = vld [vmem:[#allocation7 + $0x54] ss:$8 sps:$4 sm:$0xff]  }
 0x13a   : > { %v3605_v11 = vld [vmem:[#allocation7 + $0x50] ss:$8 sps:$4 sm:$0xff]   ;;  %v3606_v12 = vld [vmem:[#allocation7 + $0x64] ss:$8 sps:$4 sm:$0xff]   ;;  %v3608_v13 = vld [vmem:[#allocation7 + $0x60] ss:$8 sps:$4 sm:$0xff]  }
 0x13b   : > { %v601_v14 = vld [vmem:[%s4808_s19 + $0x8] sm:$0xff]  ;;  %v600_v45 = vld [vmem:[%s4808_s19] sm:$0xff]  ;;  %s5077_s13 = scalar_lea.vmem [#allocation17], %s4804_s16  ;;  %s5086_s20 = scalar_lea.vmem [#allocation20], %s4804_s16 }
 0x13c   : > { %831 = vmatpush1.bf16.msra.mxu0 %v3593_v3  ;;  %v635_v15 = vpack.c.bf16 %v601_v14, %v601_v14  ;;  %v3636_v16 = vld [vmem:[#allocation8 + $0x4] ss:$8 sps:$4 sm:$0xff]   ;;  %v3638_v17 = vld [vmem:[#allocation8] ss:$8 sps:$4 sm:$0xff]   ;;  %v3609_v18 = vld [vmem:[#allocation7 + $0x74] ss:$8 sps:$4 sm:$0xff]   ;;  %v634_v48 = vpack.c.bf16 %v600_v45, %v600_v45 }
 0x13d   : > { %832 = vmatprep.subr.bf16.mxu0 %v3594_v4  ;;  %v3639_v19 = vld [vmem:[#allocation8 + $0x14] ss:$8 sps:$4 sm:$0xff]   ;;  %1063 = vmatprep.subr.bf16.mxu1 %v3636_v16  ;;  %v3611_v20 = vld [vmem:[#allocation7 + $0x70] ss:$8 sps:$4 sm:$0xff]   ;;  %v3612_v21 = vld [vmem:[#allocation7 + $0x84] ss:$8 sps:$4 sm:$0xff]  }
 0x13e   : > { %860 = vmatprep.mubr.bf16.mxu0 %v635_v15  ;;  %1064 = vmatpush1.bf16.xpose.msra.mxu1 %v3638_v17  ;;  %v3614_v22 = vld [vmem:[#allocation7 + $0x80] ss:$8 sps:$4 sm:$0xff]   ;;  %v3641_v23 = vld [vmem:[#allocation8 + $0x10] ss:$8 sps:$4 sm:$0xff]   ;;  %v3642_v24 = vld [vmem:[#allocation8 + $0x24] ss:$8 sps:$4 sm:$0xff]  }
 0x13f   : > { %1065 = vmatprep.subr.bf16.mxu1 %v3639_v19  ;;  %v3615_v25 = vld [vmem:[#allocation7 + $0x94] ss:$8 sps:$4 sm:$0xff]   ;;  %v3617_v26 = vld [vmem:[#allocation7 + $0x90] ss:$8 sps:$4 sm:$0xff]   ;;  %v3618_v27 = vld [vmem:[#allocation7 + $0xa4] ss:$8 sps:$4 sm:$0xff]  }
 0x140   : > { %833 = vmatpush1.bf16.msra.mxu0 %v3596_v5  ;;  %v3620_v28 = vld [vmem:[#allocation7 + $0xa0] ss:$8 sps:$4 sm:$0xff]   ;;  %v3645_v30 = vld [vmem:[#allocation8 + $0x34] ss:$8 sps:$4 sm:$0xff]   ;;  %v3623_v32 = vld [vmem:[#allocation7 + $0xb0] ss:$8 sps:$4 sm:$0xff]  }
 0x141   : > { %834 = vmatprep.subr.bf16.mxu0 %v3597_v6  ;;  %v3644_v29 = vld [vmem:[#allocation8 + $0x20] ss:$8 sps:$4 sm:$0xff]   ;;  %v3621_v31 = vld [vmem:[#allocation7 + $0xb4] ss:$8 sps:$4 sm:$0xff]   ;;  %v3624_v33 = vld [vmem:[#allocation7 + $0xc4] ss:$8 sps:$4 sm:$0xff]  }
 0x142   : > { %v3647_v34 = vld [vmem:[#allocation8 + $0x30] ss:$8 sps:$4 sm:$0xff]   ;;  %v3626_v35 = vld [vmem:[#allocation7 + $0xc0] ss:$8 sps:$4 sm:$0xff]   ;;  %v3648_v36 = vld [vmem:[#allocation8 + $0x44] ss:$8 sps:$4 sm:$0xff]  }
 0x143   : > { %v3627_v37 = vld [vmem:[#allocation7 + $0xd4] ss:$8 sps:$4 sm:$0xff]   ;;  %v3629_v38 = vld [vmem:[#allocation7 + $0xd0] ss:$8 sps:$4 sm:$0xff]   ;;  %v3630_v39 = vld [vmem:[#allocation7 + $0xe4] ss:$8 sps:$4 sm:$0xff]  }
 0x144   : > { %835 = vmatpush1.bf16.msra.mxu0 %v3599_v7  ;;  %v3650_v40 = vld [vmem:[#allocation8 + $0x40] ss:$8 sps:$4 sm:$0xff]   ;;  %v3651_v42 = vld [vmem:[#allocation8 + $0x54] ss:$8 sps:$4 sm:$0xff]   ;;  %v3635_v44 = vld [vmem:[#allocation7 + $0xf0] ss:$8 sps:$4 sm:$0xff]  }
 0x145   : > { %836 = vmatprep.subr.bf16.mxu0 %v3600_v8  ;;  %v3632_v41 = vld [vmem:[#allocation7 + $0xe0] ss:$8 sps:$4 sm:$0xff]   ;;  %v3633_v43 = vld [vmem:[#allocation7 + $0xf4] ss:$8 sps:$4 sm:$0xff]   ;;  %v3653_v46 = vld [vmem:[#allocation8 + $0x50] ss:$8 sps:$4 sm:$0xff]  }
 0x146   : > { %1066 = vmatpush1.bf16.xpose.msra.mxu1 %v3641_v23  ;;  %v3654_v47 = vld [vmem:[#allocation8 + $0x64] ss:$8 sps:$4 sm:$0xff]   ;;  %v3656_v49 = vld [vmem:[#allocation8 + $0x60] ss:$8 sps:$4 sm:$0xff]   ;;  %v3657_v50 = vld [vmem:[#allocation8 + $0x74] ss:$8 sps:$4 sm:$0xff]  }
 0x147   : > { %1067 = vmatprep.subr.bf16.mxu1 %v3642_v24  ;;  %v3659_v51 = vld [vmem:[#allocation8 + $0x70] ss:$8 sps:$4 sm:$0xff]   ;;  %v3660_v52 = vld [vmem:[#allocation8 + $0x84] ss:$8 sps:$4 sm:$0xff]   ;;  %v3662_v53 = vld [vmem:[#allocation8 + $0x80] ss:$8 sps:$4 sm:$0xff]  }
 0x148   : > { %837 = vmatpush1.bf16.msra.mxu0 %v3602_v9  ;;  %v3663_v54 = vld [vmem:[#allocation8 + $0x94] ss:$8 sps:$4 sm:$0xff]   ;;  %v3665_v55 = vld [vmem:[#allocation8 + $0x90] ss:$8 sps:$4 sm:$0xff]   ;;  %v3666_v56 = vld [vmem:[#allocation8 + $0xa4] ss:$8 sps:$4 sm:$0xff]  }
 0x149   : > { %838 = vmatprep.subr.bf16.mxu0 %v3603_v10  ;;  %v3668_v57 = vld [vmem:[#allocation8 + $0xa0] ss:$8 sps:$4 sm:$0xff]   ;;  %v3669_v58 = vld [vmem:[#allocation8 + $0xb4] ss:$8 sps:$4 sm:$0xff]   ;;  %v3671_v59 = vld [vmem:[#allocation8 + $0xb0] ss:$8 sps:$4 sm:$0xff]  }
 0x14a   : > { %v3672_v60 = vld [vmem:[#allocation8 + $0xc4] ss:$8 sps:$4 sm:$0xff]   ;;  %v3674_v61 = vld [vmem:[#allocation8 + $0xc0] ss:$8 sps:$4 sm:$0xff]   ;;  %v3675_v62 = vld [vmem:[#allocation8 + $0xd4] ss:$8 sps:$4 sm:$0xff]  }
 0x14b   : > { %v3677_v63 = vld [vmem:[#allocation8 + $0xd0] ss:$8 sps:$4 sm:$0xff]   ;;  %v3678_v0 = vld [vmem:[#allocation8 + $0xe4] ss:$8 sps:$4 sm:$0xff]   ;;  %v3680_v1 = vld [vmem:[#allocation8 + $0xe0] ss:$8 sps:$4 sm:$0xff]  }
 0x14c   : > { %839 = vmatpush1.bf16.msra.mxu0 %v3605_v11  ;;  %v3681_v2 = vld [vmem:[#allocation8 + $0xf4] ss:$8 sps:$4 sm:$0xff]   ;;  %v3683_v3 = vld [vmem:[#allocation8 + $0xf0] ss:$8 sps:$4 sm:$0xff]   ;;  %v4843_v4 = vld [vmem:[%s4818_s15 + $0x4] ss:$8 sps:$4 sm:$0xff]  }
 0x14d   : > { %840 = vmatprep.subr.bf16.mxu0 %v3606_v12  ;;  %v4846_v5 = vld [vmem:[%s4818_s15] ss:$8 sps:$4 sm:$0xff]   ;;  %v4849_v6 = vld [vmem:[%s4818_s15 + $0x14] ss:$8 sps:$4 sm:$0xff]   ;;  %v4854_v7 = vld [vmem:[%s4818_s15 + $0x10] ss:$8 sps:$4 sm:$0xff]  }
 0x14e   : > { %1068 = vmatpush1.bf16.xpose.msra.mxu1 %v3644_v29  ;;  %v4858_v8 = vld [vmem:[%s4818_s15 + $0x24] ss:$8 sps:$4 sm:$0xff]   ;;  %v4862_v9 = vld [vmem:[%s4818_s15 + $0x20] ss:$8 sps:$4 sm:$0xff]   ;;  %v4866_v10 = vld [vmem:[%s4818_s15 + $0x34] ss:$8 sps:$4 sm:$0xff]  }
 0x14f   : > { %1069 = vmatprep.subr.bf16.mxu1 %v3645_v30  ;;  %v4870_v11 = vld [vmem:[%s4818_s15 + $0x30] ss:$8 sps:$4 sm:$0xff]   ;;  %v4874_v12 = vld [vmem:[%s4818_s15 + $0x44] ss:$8 sps:$4 sm:$0xff]   ;;  %v4882_v14 = vld [vmem:[%s4818_s15 + $0x54] ss:$8 sps:$4 sm:$0xff]  }
 0x150   : > { %841 = vmatpush1.bf16.msra.mxu0 %v3608_v13  ;;  %v4878_v13 = vld [vmem:[%s4818_s15 + $0x40] ss:$8 sps:$4 sm:$0xff]   ;;  %v4886_v15 = vld [vmem:[%s4818_s15 + $0x50] ss:$8 sps:$4 sm:$0xff]   ;;  %v4890_v16 = vld [vmem:[%s4818_s15 + $0x64] ss:$8 sps:$4 sm:$0xff]  }
 0x151   : > { %842 = vmatprep.subr.bf16.mxu0 %v3609_v18  ;;  %v4894_v17 = vld [vmem:[%s4818_s15 + $0x60] ss:$8 sps:$4 sm:$0xff]   ;;  %v4898_v18 = vld [vmem:[%s4818_s15 + $0x74] ss:$8 sps:$4 sm:$0xff]   ;;  %v4902_v19 = vld [vmem:[%s4818_s15 + $0x70] ss:$8 sps:$4 sm:$0xff]  }
 0x152   : > { %v4918_v23 = vld [vmem:[%s4818_s15 + $0x90] ss:$8 sps:$4 sm:$0xff]   ;;  %v4922_v24 = vld [vmem:[%s4818_s15 + $0xa4] ss:$8 sps:$4 sm:$0xff]   ;;  %v4942_v29 = vld [vmem:[%s4818_s15 + $0xc0] ss:$8 sps:$4 sm:$0xff]  }
 0x153   : > { %v4946_v30 = vld [vmem:[%s4818_s15 + $0xd4] ss:$8 sps:$4 sm:$0xff]   ;;  %s3161_s18 = sshll.u32 %s4801_s17, 9  ;;  %s2869_s26 = sshll.u32 %s5086_s20, 4  ;;  %s5153_s26 = int_to_ptr.vmem [resolvable:$true] %s2869_s26 }
 0x154   : > { %843 = vmatpush1.bf16.msra.mxu0 %v3611_v20  ;;  %v4906_v20 = vld [vmem:[%s4818_s15 + $0x84] ss:$8 sps:$4 sm:$0xff]   ;;  %s5091_s9 = scalar_lea.vmem [#allocation18], %s3161_s18  ;;  %s3421_s11 = sshll.u32 %s4493_s27, 13 }
 0x155   : > { %844 = vmatprep.subr.bf16.mxu0 %v3612_v21  ;;  %v4910_v21 = vld [vmem:[%s4818_s15 + $0x80] ss:$8 sps:$4 sm:$0xff]   ;;  %s5358_s25 = sld [smem:[#allocation40_spill]]  ;;  %s2852_s29 = sshll.u32 %s5091_s9, 4  ;;  %s5165_s29 = int_to_ptr.vmem [resolvable:$true] %s2852_s29 }
 0x156   : > { %1070 = vmatpush1.bf16.xpose.msra.mxu1 %v3647_v34  ;;  %s2839_s3 = sshll.u32 %s5077_s13, 4  ;;  %s5173_s28 = scalar_lea.sflag [#allocation19], %s506_s0  ;;  %s2840_s3 = int_to_ptr.vmem [resolvable:$true] %s2839_s3 }
 0x157   : > { %1071 = vmatprep.subr.bf16.mxu1 %v3648_v36  ;;  %p5359_p10 = scmp.ne.s32.totalorder %s5341_s12, 0 }
 0x158   : > { %845 = vmatpush1.bf16.msra.mxu0 %v3614_v22  ;;  %v4914_v22 = vld [vmem:[%s4818_s15 + $0x94] ss:$8 sps:$4 sm:$0xff]  }
 0x159   : > { %846 = vmatprep.subr.bf16.mxu0 %v3615_v25  ;;  %v4926_v25 = vld [vmem:[%s4818_s15 + $0xa0] ss:$8 sps:$4 sm:$0xff]  }
 0x15b   : > { %s5161_s16 = scalar_lea.hbm %s5358_s25, %s3421_s11 }
 0x15c   : > { %847 = vmatpush1.bf16.msra.mxu0 %v3617_v26  ;;  %v4930_v26 = vld [vmem:[%s4818_s15 + $0xb4] ss:$8 sps:$4 sm:$0xff]  }
 0x15d   : > { %848 = vmatprep.subr.bf16.mxu0 %v3618_v27  ;;  %v4934_v27 = vld [vmem:[%s4818_s15 + $0xb0] ss:$8 sps:$4 sm:$0xff]  }
 0x15e   : > { %1072 = vmatpush1.bf16.xpose.msra.mxu1 %v3650_v40  ;;  %v4963_v40 = vld [vmem:[%s4818_s15 + $0xf4] ss:$8 sps:$4 sm:$0xff]  }
 0x15f   : > { %1073 = vmatprep.subr.bf16.mxu1 %v3651_v42 }
 0x160   : > { %849 = vmatpush1.bf16.msra.mxu0 %v3620_v28  ;;  %v4938_v28 = vld [vmem:[%s4818_s15 + $0xc4] ss:$8 sps:$4 sm:$0xff]  }
 0x161   : > { %850 = vmatprep.subr.bf16.mxu0 %v3621_v31  ;;  %v4950_v31 = vld [vmem:[%s4818_s15 + $0xd0] ss:$8 sps:$4 sm:$0xff]  }
 0x164   : > { %851 = vmatpush1.bf16.msra.mxu0 %v3623_v32  ;;  %v4954_v32 = vld [vmem:[%s4818_s15 + $0xe4] ss:$8 sps:$4 sm:$0xff]  }
 0x165   : > { %852 = vmatprep.subr.bf16.mxu0 %v3624_v33  ;;  %v4958_v33 = vld [vmem:[%s4818_s15 + $0xe0] ss:$8 sps:$4 sm:$0xff]  }
 0x166   : > { %1074 = vmatpush1.bf16.xpose.msra.mxu1 %v3653_v46 }
 0x167   : > { %1075 = vmatprep.subr.bf16.mxu1 %v3654_v47 }
 0x168   : > { %853 = vmatpush1.bf16.msra.mxu0 %v3626_v35 }
 0x169   : > { %854 = vmatprep.subr.bf16.mxu0 %v3627_v37 }
 0x16c   : > { %855 = vmatpush1.bf16.msra.mxu0 %v3629_v38 }
 0x16d   : > { %856 = vmatprep.subr.bf16.mxu0 %v3630_v39 }
 0x16e   : > { %1076 = vmatpush1.bf16.xpose.msra.mxu1 %v3656_v49 }
 0x16f   : > { %1077 = vmatprep.subr.bf16.mxu1 %v3657_v50 }
 0x170   : > { %857 = vmatpush1.bf16.msra.mxu0 %v3632_v41  ;;  %v4966_v41 = vld [vmem:[%s4818_s15 + $0xf0] ss:$8 sps:$4 sm:$0xff]   ;;  %s4208_s15 = scalar_lea.vmem %s5165_s29, 8192 }
 0x171   : > { %858 = vmatprep.subr.bf16.mxu0 %v3633_v43  ;;  %p4209_p6 = scmp.ne.s32.totalorder %s5165_s29, %s4208_s15 }
 0x173   : > { %p4210_p5 = pnand %p4209_p6, %p5359_p10 }
 0x174   : > { %859 = vmatpush1.bf16.msra.mxu0 %v3635_v44 }
 0x175   : > { %1266 = vmatprep.subr.bf16.mxu0 %v4843_v4  ;;  %p4211_p9 = pneg %p4210_p5 }
 0x176   : > { %1078 = vmatpush1.bf16.xpose.msra.mxu1 %v3659_v51 }
 0x177   : > { %861 = vmatmul.mubr.bf16.vlgmr.msra.gmra.mrb[0].mxu0 %v634_v48  ;;  %1079 = vmatprep.subr.bf16.mxu1 %v3660_v52 }
 0x178   : > { %1267 = vmatpush1.bf16.msra.mxu0 %v4846_v5 }
 0x179   : > { %1268 = vmatprep.subr.bf16.mxu0 %v4849_v6 }
 0x17c   : > { %1269 = vmatpush1.bf16.msra.mxu0 %v4854_v7 }
 0x17d   : > { %1270 = vmatprep.subr.bf16.mxu0 %v4858_v8 }
 0x17e   : > { %1080 = vmatpush1.bf16.xpose.msra.mxu1 %v3662_v53 }
 0x17f   : > { %1081 = vmatprep.subr.bf16.mxu1 %v3663_v54 }
 0x180   : > { %1271 = vmatpush1.bf16.msra.mxu0 %v4862_v9 }
 0x181   : > { %1272 = vmatprep.subr.bf16.mxu0 %v4866_v10 }
 0x184   : > { %1273 = vmatpush1.bf16.msra.mxu0 %v4870_v11 }
 0x185   : > { %1274 = vmatprep.subr.bf16.mxu0 %v4874_v12 }
 0x186   : > { %1082 = vmatpush1.bf16.xpose.msra.mxu1 %v3665_v55 }
 0x187   : > { %1083 = vmatprep.subr.bf16.mxu1 %v3666_v56 }
 0x188   : > { %1275 = vmatpush1.bf16.msra.mxu0 %v4878_v13 }
 0x189   : > { %1276 = vmatprep.subr.bf16.mxu0 %v4882_v14 }
 0x18c   : > { %1277 = vmatpush1.bf16.msra.mxu0 %v4886_v15 }
 0x18d   : > { %1278 = vmatprep.subr.bf16.mxu0 %v4890_v16 }
 0x18e   : > { %1084 = vmatpush1.bf16.xpose.msra.mxu1 %v3668_v57 }
 0x18f   : > { %1085 = vmatprep.subr.bf16.mxu1 %v3669_v58 }
 0x190   : > { %1279 = vmatpush1.bf16.msra.mxu0 %v4894_v17 }
 0x191   : > { %1280 = vmatprep.subr.bf16.mxu0 %v4898_v18 }
 0x194   : > { %1281 = vmatpush1.bf16.msra.mxu0 %v4902_v19 }
 0x195   : > { %1282 = vmatprep.subr.bf16.mxu0 %v4906_v20 }
 0x196   : > { %1086 = vmatpush1.bf16.xpose.msra.mxu1 %v3671_v59 }
 0x197   : > { %1087 = vmatprep.subr.bf16.mxu1 %v3672_v60 }
 0x198   : > { %1283 = vmatpush1.bf16.msra.mxu0 %v4910_v21 }
 0x199   : > { %1284 = vmatprep.subr.bf16.mxu0 %v4914_v22 }
 0x19c   : > { %1285 = vmatpush1.bf16.msra.mxu0 %v4918_v23 }
 0x19d   : > { %1286 = vmatprep.subr.bf16.mxu0 %v4922_v24 }
 0x19e   : > { %1088 = vmatpush1.bf16.xpose.msra.mxu1 %v3674_v61 }
 0x19f   : > { %1089 = vmatprep.subr.bf16.mxu1 %v3675_v62 }
 0x1a0   : > { %1287 = vmatpush1.bf16.msra.mxu0 %v4926_v25 }
 0x1a1   : > { %1288 = vmatprep.subr.bf16.mxu0 %v4930_v26 }
 0x1a4   : > { %1289 = vmatpush1.bf16.msra.mxu0 %v4934_v27 }
 0x1a5   : > { %1290 = vmatprep.subr.bf16.mxu0 %v4938_v28 }
 0x1a6   : > { %1090 = vmatpush1.bf16.xpose.msra.mxu1 %v3677_v63  ;;  %v3732_v63 = vld [vmem:[#allocation10] ss:$8 sps:$4 sm:$0xff]  }
 0x1a7   : > { %1091 = vmatprep.subr.bf16.mxu1 %v3678_v0  ;;  %v3734_v0 = vld [vmem:[#allocation10 + $0x4] ss:$8 sps:$4 sm:$0xff]  }
 0x1a8   : > { %1291 = vmatpush1.bf16.msra.mxu0 %v4942_v29 }
 0x1a9   : > { %1292 = vmatprep.subr.bf16.mxu0 %v4946_v30 }
 0x1ac   : > { %1293 = vmatpush1.bf16.msra.mxu0 %v4950_v31 }
 0x1ad   : > { %1294 = vmatprep.subr.bf16.mxu0 %v4954_v32 }
 0x1ae   : > { %1092 = vmatpush1.bf16.xpose.msra.mxu1 %v3680_v1  ;;  %v3737_v1 = vld [vmem:[#allocation10 + $0x14] ss:$8 sps:$4 sm:$0xff]  }
 0x1af   : > { %1093 = vmatprep.subr.bf16.mxu1 %v3681_v2  ;;  %v3735_v2 = vld [vmem:[#allocation10 + $0x10] ss:$8 sps:$4 sm:$0xff]  }
 0x1b0   : > { %1295 = vmatpush1.bf16.msra.mxu0 %v4958_v33 }
 0x1b1   : > { %1296 = vmatprep.subr.bf16.mxu0 %v4963_v40 }
 0x1b4   : > { %1297 = vmatpush1.bf16.msra.mxu0 %v4966_v41 }
 0x1b5   : > { %1326 = vmatprep.subr.bf16.mxu0 %v4843_v4 }
 0x1b6   : > { %1094 = vmatpush1.bf16.xpose.msra.mxu1 %v3683_v3  ;;  %v3740_v3 = vld [vmem:[#allocation10 + $0x24] ss:$8 sps:$4 sm:$0xff]  }
 0x1b7   : > { %1561 = vmatprep.subr.bf16.mxu1 %v3734_v0 }
 0x24a   : > { %v862_v34 = vpop.f32.mrb[0].mxu0 }
 0x24b   : > { %v864_v35 = vpop.f32.mrb[1].mxu0  ;;  %v869_v38 = vpack.c.bf16 %v862_v34, %v862_v34  ;;  %v3738_v34 = vld [vmem:[#allocation10 + $0x20] ss:$8 sps:$4 sm:$0xff]  }
 0x24c   : > { %v866_v36 = vpop.f32.mrb[2].mxu0  ;;  %v870_v37 = vpack.c.bf16 %v864_v35, %v864_v35  ;;  %v3743_v35 = vld [vmem:[#allocation10 + $0x34] ss:$8 sps:$4 sm:$0xff]  }
 0x24d   : > { %v867_v39 = vpop.f32.mrb[3].mxu0  ;;  %v3741_v36 = vld [vmem:[#allocation10 + $0x30] ss:$8 sps:$4 sm:$0xff]  }
 0x24e   : > { %1095 = vmatprep.mubr.bf16.mxu1 %v870_v37  ;;  %v3746_v37 = vld [vmem:[#allocation10 + $0x44] ss:$8 sps:$4 sm:$0xff]   ;;  %v3749_v39 = vld [vmem:[#allocation10 + $0x54] ss:$8 sps:$4 sm:$0xff]  }
 0x24f   : > { %1096 = vmatmul.mubr.bf16.vlgmr.msra.gmra.mrb[0].mxu1 %v869_v38  ;;  %v3744_v38 = vld [vmem:[#allocation10 + $0x40] ss:$8 sps:$4 sm:$0xff]  }
 0x250   : > { %1562 = vmatpush1.bf16.msra.mxu1 %v3732_v63 }
 0x251   : > { %1563 = vmatprep.subr.bf16.mxu1 %v3737_v1 }
 0x254   : > { %1564 = vmatpush1.bf16.msra.mxu1 %v3735_v2 }
 0x255   : > { %1565 = vmatprep.subr.bf16.mxu1 %v3740_v3 }
 0x258   : > { %1566 = vmatpush1.bf16.msra.mxu1 %v3738_v34 }
 0x259   : > { %1567 = vmatprep.subr.bf16.mxu1 %v3743_v35  ;;  %v3782_v35 = vld [vmem:[#allocation11 + $0x4] ss:$8 sps:$4 sm:$0xff]  }
 0x25c   : > { %1568 = vmatpush1.bf16.msra.mxu1 %v3741_v36 }
 0x25d   : > { %1569 = vmatprep.subr.bf16.mxu1 %v3746_v37 }
 0x260   : > { %1570 = vmatpush1.bf16.msra.mxu1 %v3744_v38 }
 0x261   : > { %1571 = vmatprep.subr.bf16.mxu1 %v3749_v39 }
 0x322   : > { %v1097_v42 = vpop.f32.mrb[0].mxu1 }
 0x323   : > { %v1099_v43 = vpop.f32.mrb[1].mxu1  ;;  %v1104_v46 = vpack.c.bf16 %v1097_v42, %v1097_v42  ;;  %v3747_v42 = vld [vmem:[#allocation10 + $0x50] ss:$8 sps:$4 sm:$0xff]  }
 0x324   : > { %v1105_v44 = vpack.c.bf16 %v1099_v43, %v1099_v43  ;;  %v1101_v45 = vpop.f32.mrb[2].mxu1  ;;  %v3752_v43 = vld [vmem:[#allocation10 + $0x64] ss:$8 sps:$4 sm:$0xff]   ;;  %1572 = vmatpush1.bf16.msra.mxu1 %v3747_v42  ;;  %v3780_v42 = vld [vmem:[#allocation11] ss:$8 sps:$4 sm:$0xff]  }
 0x325   : > { %v1102_v47 = vpop.f32.mrb[3].mxu1  ;;  %1573 = vmatprep.subr.bf16.mxu1 %v3752_v43  ;;  %v3755_v45 = vld [vmem:[#allocation10 + $0x74] ss:$8 sps:$4 sm:$0xff]  }
 0x326   : > { %1298 = vmatprep.mubr.bf16.mxu0 %v1105_v44  ;;  %v3750_v44 = vld [vmem:[#allocation10 + $0x60] ss:$8 sps:$4 sm:$0xff]   ;;  %v3758_v47 = vld [vmem:[#allocation10 + $0x84] ss:$8 sps:$4 sm:$0xff]  }
 0x327   : > { %1299 = vmatmul.mubr.bf16.vlgmr.msra.gmra.mrb[4].mxu0 %v1104_v46  ;;  %v3753_v46 = vld [vmem:[#allocation10 + $0x70] ss:$8 sps:$4 sm:$0xff]  }
 0x328   : > { %1327 = vmatpush1.bf16.xpose.msra.mxu0 %v4846_v5  ;;  %1574 = vmatpush1.bf16.msra.mxu1 %v3750_v44 }
 0x329   : > { %1328 = vmatprep.subr.bf16.mxu0 %v4849_v6  ;;  %1575 = vmatprep.subr.bf16.mxu1 %v3755_v45  ;;  %v3785_v45 = vld [vmem:[#allocation11 + $0x14] ss:$8 sps:$4 sm:$0xff]  }
 0x32c   : > { %1576 = vmatpush1.bf16.msra.mxu1 %v3753_v46  ;;  %v3783_v46 = vld [vmem:[#allocation11 + $0x10] ss:$8 sps:$4 sm:$0xff]  }
 0x32d   : > { %1577 = vmatprep.subr.bf16.mxu1 %v3758_v47  ;;  %v3788_v47 = vld [vmem:[#allocation11 + $0x24] ss:$8 sps:$4 sm:$0xff]  }
 0x330   : > { %1329 = vmatpush1.bf16.xpose.msra.mxu0 %v4854_v7 }
 0x331   : > { %1330 = vmatprep.subr.bf16.mxu0 %v4858_v8 }
 0x338   : > { %1331 = vmatpush1.bf16.xpose.msra.mxu0 %v4862_v9 }
 0x339   : > { %1332 = vmatprep.subr.bf16.mxu0 %v4866_v10 }
 0x340   : > { %1333 = vmatpush1.bf16.xpose.msra.mxu0 %v4870_v11 }
 0x341   : > { %1334 = vmatprep.subr.bf16.mxu0 %v4874_v12 }
 0x348   : > { %1335 = vmatpush1.bf16.xpose.msra.mxu0 %v4878_v13 }
 0x349   : > { %1336 = vmatprep.subr.bf16.mxu0 %v4882_v14 }
 0x350   : > { %1337 = vmatpush1.bf16.xpose.msra.mxu0 %v4886_v15 }
 0x351   : > { %1338 = vmatprep.subr.bf16.mxu0 %v4890_v16 }
 0x358   : > { %1339 = vmatpush1.bf16.xpose.msra.mxu0 %v4894_v17 }
 0x359   : > { %1340 = vmatprep.subr.bf16.mxu0 %v4898_v18 }
 0x360   : > { %1341 = vmatpush1.bf16.xpose.msra.mxu0 %v4902_v19 }
 0x361   : > { %1342 = vmatprep.subr.bf16.mxu0 %v4906_v20 }
 0x368   : > { %1343 = vmatpush1.bf16.xpose.msra.mxu0 %v4910_v21 }
 0x369   : > { %1344 = vmatprep.subr.bf16.mxu0 %v4914_v22 }
 0x370   : > { %1345 = vmatpush1.bf16.xpose.msra.mxu0 %v4918_v23 }
 0x371   : > { %1346 = vmatprep.subr.bf16.mxu0 %v4922_v24 }
 0x378   : > { %1347 = vmatpush1.bf16.xpose.msra.mxu0 %v4926_v25 }
 0x379   : > { %1348 = vmatprep.subr.bf16.mxu0 %v4930_v26 }
 0x380   : > { %1349 = vmatpush1.bf16.xpose.msra.mxu0 %v4934_v27 }
 0x381   : > { %1350 = vmatprep.subr.bf16.mxu0 %v4938_v28 }
 0x388   : > { %1351 = vmatpush1.bf16.xpose.msra.mxu0 %v4942_v29 }
 0x389   : > { %1352 = vmatprep.subr.bf16.mxu0 %v4946_v30 }
 0x390   : > { %1353 = vmatpush1.bf16.xpose.msra.mxu0 %v4950_v31 }
 0x391   : > { %1354 = vmatprep.subr.bf16.mxu0 %v4954_v32 }
 0x398   : > { %1355 = vmatpush1.bf16.xpose.msra.mxu0 %v4958_v33 }
 0x399   : > { %1356 = vmatprep.subr.bf16.mxu0 %v4963_v40 }
 0x3a0   : > { %1357 = vmatpush1.bf16.xpose.msra.mxu0 %v4966_v41 }
 0x3a1   : > { %2095 = vmatprep.subr.bf16.mxu0 %v4843_v4 }
 0x3fa   : > { %v1300_v48 = vpop.f32.mrb[4].mxu0 }
 0x3fb   : > { %v1307_v49 = vmul.f32 0.0625, %v1300_v48  ;;  %v1302_v50 = vpop.f32.mrb[5].mxu0  ;;  %v3756_v48 = vld [vmem:[#allocation10 + $0x80] ss:$8 sps:$4 sm:$0xff]  }
 0x3fc   : > { %v1308_v51 = vmul.f32 0.0625, %v1302_v50  ;;  %v1304_v52 = vpop.f32.mrb[6].mxu0  ;;  %1578 = vmatpush1.bf16.msra.mxu1 %v3756_v48  ;;  %v3759_v50 = vld [vmem:[#allocation10 + $0x90] ss:$8 sps:$4 sm:$0xff]   ;;  %v3786_v48 = vld [vmem:[#allocation11 + $0x20] ss:$8 sps:$4 sm:$0xff]  }
 0x3fd   : > { %v1305_v53 = vpop.f32.mrb[7].mxu0  ;;  %v3762_v52 = vld [vmem:[#allocation10 + $0xa0] ss:$8 sps:$4 sm:$0xff]  }
 0x3fe   : > { %v1309_v54 = vmax.f32 %v1307_v49, %v1308_v51  ;;  %v3767_v53 = vld [vmem:[#allocation10 + $0xb4] ss:$8 sps:$4 sm:$0xff]  }
 0x400   : > { %1310 = vmax.xlane.f32.xlu0 %v1309_v54  ;;  %v3765_v54 = vld [vmem:[#allocation10 + $0xb0] ss:$8 sps:$4 sm:$0xff]  }
 0x48d   : > { %v1311_v55 = vpop.xlane.xlu0 %1310 }
 0x48e   : > { %v1312_v56 = vsub.f32 %v1307_v49, %v1311_v55  ;;  %v1313_v57 = vsub.f32 %v1308_v51, %v1311_v55  ;;  %v3761_v49 = vld [vmem:[#allocation10 + $0x94] ss:$8 sps:$4 sm:$0xff]   ;;  %v3764_v51 = vld [vmem:[#allocation10 + $0xa4] ss:$8 sps:$4 sm:$0xff]  }
 0x48f   : > { %1579 = vmatprep.subr.bf16.mxu1 %v3761_v49  ;;  %v3770_v55 = vld [vmem:[#allocation10 + $0xc4] ss:$8 sps:$4 sm:$0xff]   ;;  %v3791_v49 = vld [vmem:[#allocation11 + $0x34] ss:$8 sps:$4 sm:$0xff]  }
 0x490   : > { %v1314_v58 = vmul.f32 1.442695, %v1312_v56  ;;  %v1316_v59 = vmul.f32 1.442695, %v1313_v57  ;;  %1580 = vmatpush1.bf16.msra.mxu1 %v3759_v50  ;;  %v3768_v56 = vld [vmem:[#allocation10 + $0xc0] ss:$8 sps:$4 sm:$0xff]  }
 0x491   : > { %1581 = vmatprep.subr.bf16.mxu1 %v3764_v51  ;;  %v3773_v57 = vld [vmem:[#allocation10 + $0xd4] ss:$8 sps:$4 sm:$0xff]   ;;  %v3789_v50 = vld [vmem:[#allocation11 + $0x30] ss:$8 sps:$4 sm:$0xff]   ;;  %v3794_v51 = vld [vmem:[#allocation11 + $0x44] ss:$8 sps:$4 sm:$0xff]  }
 0x492   : > { %3940 = vpow2.f32 %v1314_v58  ;;  %v3771_v58 = vld [vmem:[#allocation10 + $0xd0] ss:$8 sps:$4 sm:$0xff]  }
 0x493   : > { %3942 = vpow2.f32 %v1316_v59  ;;  %v3776_v59 = vld [vmem:[#allocation10 + $0xe4] ss:$8 sps:$4 sm:$0xff]  }
 0x494   : > { %1582 = vmatpush1.bf16.msra.mxu1 %v3762_v52  ;;  %v3792_v52 = vld [vmem:[#allocation11 + $0x40] ss:$8 sps:$4 sm:$0xff]  }
 0x495   : > { %1583 = vmatprep.subr.bf16.mxu1 %v3767_v53  ;;  %v3797_v53 = vld [vmem:[#allocation11 + $0x54] ss:$8 sps:$4 sm:$0xff]  }
 0x498   : > { %1584 = vmatpush1.bf16.msra.mxu1 %v3765_v54  ;;  %v3795_v54 = vld [vmem:[#allocation11 + $0x50] ss:$8 sps:$4 sm:$0xff]  }
 0x499   : > { %1585 = vmatprep.subr.bf16.mxu1 %v3770_v55  ;;  %v3800_v55 = vld [vmem:[#allocation11 + $0x64] ss:$8 sps:$4 sm:$0xff]  }
 0x49c   : > { %v5003_v60 = vpop.eup %3940  ;;  %1586 = vmatpush1.bf16.msra.mxu1 %v3768_v56  ;;  %v3798_v56 = vld [vmem:[#allocation11 + $0x60] ss:$8 sps:$4 sm:$0xff]  }
 0x49d   : > { %v5005_v61 = vpop.eup %3942  ;;  %1587 = vmatprep.subr.bf16.mxu1 %v3773_v57  ;;  %v3803_v57 = vld [vmem:[#allocation11 + $0x74] ss:$8 sps:$4 sm:$0xff]  }
 0x49e   : > { %v1318_v62 = vadd.f32 %v5005_v61, %v5003_v60 }
 0x4a0   : > { %1319 = vadd.xlane.f32.xlu0 %v1318_v62  ;;  %1588 = vmatpush1.bf16.msra.mxu1 %v3771_v58  ;;  %v3774_v62 = vld [vmem:[#allocation10 + $0xe0] ss:$8 sps:$4 sm:$0xff]   ;;  %v3801_v58 = vld [vmem:[#allocation11 + $0x70] ss:$8 sps:$4 sm:$0xff]  }
 0x4a1   : > { %1589 = vmatprep.subr.bf16.mxu1 %v3776_v59  ;;  %v3806_v59 = vld [vmem:[#allocation11 + $0x84] ss:$8 sps:$4 sm:$0xff]  }
 0x4a4   : > { %1590 = vmatpush1.bf16.msra.mxu1 %v3774_v62  ;;  %v3804_v62 = vld [vmem:[#allocation11 + $0x80] ss:$8 sps:$4 sm:$0xff]  }
 0x52d   : > { %v1320_v63 = vpop.xlane.xlu0 %1319 }
 0x52e   : > { %3944 = vrcp.f32 %v1320_v63  ;;  %v3809_v63 = vld [vmem:[#allocation11 + $0x94] ss:$8 sps:$4 sm:$0xff]  }
 0x538   : > { %v3945_v0 = vpop.eup %3944 }
 0x539   : > { %v1323_v1 = vmul.f32 %v3945_v0, %v5005_v61  ;;  %v1322_v2 = vmul.f32 %v3945_v0, %v5003_v60  ;;  %v3779_v60 = vld [vmem:[#allocation10 + $0xf4] ss:$8 sps:$4 sm:$0xff]   ;;  %v3777_v61 = vld [vmem:[#allocation10 + $0xf0] ss:$8 sps:$4 sm:$0xff]  }
 0x53a   : > { %1591 = vmatprep.subr.bf16.mxu1 %v3779_v60  ;;  %v3807_v0 = vld [vmem:[#allocation11 + $0x90] ss:$8 sps:$4 sm:$0xff]   ;;  %v3818_v60 = vld [vmem:[#allocation11 + $0xc4] ss:$8 sps:$4 sm:$0xff]  }
 0x53b   : > { %v1325_v3 = vpack.c.bf16 %v1323_v1, %v1323_v1  ;;  %v1324_v34 = vpack.c.bf16 %v1322_v2, %v1322_v2  ;;  %1592 = vmatpush1.bf16.msra.mxu1 %v3777_v61  ;;  %v3812_v1 = vld [vmem:[#allocation11 + $0xa4] ss:$8 sps:$4 sm:$0xff]   ;;  %v3810_v2 = vld [vmem:[#allocation11 + $0xa0] ss:$8 sps:$4 sm:$0xff]  }
 0x53c   : > { %1796 = vmatprep.subr.bf16.mxu1 %v3782_v35  ;;  %v3816_v61 = vld [vmem:[#allocation11 + $0xc0] ss:$8 sps:$4 sm:$0xff]   ;;  %v3821_v35 = vld [vmem:[#allocation11 + $0xd4] ss:$8 sps:$4 sm:$0xff]  }
 0x53d   : > { %1358 = vmatprep.mubr.bf16.mxu0 %v1325_v3  ;;  %v3815_v3 = vld [vmem:[#allocation11 + $0xb4] ss:$8 sps:$4 sm:$0xff]  }
 0x53e   : > { %1359 = vmatmul.mubr.bf16.vlgmr.msra.gmra.mrb[8].mxu0 %v1324_v34  ;;  %v3813_v34 = vld [vmem:[#allocation11 + $0xb0] ss:$8 sps:$4 sm:$0xff]  }
 0x53f   : > { %2096 = vmatpush1.bf16.msra.mxu0 %v4846_v5 }
 0x540   : > { %2097 = vmatprep.subr.bf16.mxu0 %v4849_v6 }
 0x543   : > { %2098 = vmatpush1.bf16.msra.mxu0 %v4854_v7 }
 0x544   : > { %2099 = vmatprep.subr.bf16.mxu0 %v4858_v8 }
 0x547   : > { %2100 = vmatpush1.bf16.msra.mxu0 %v4862_v9 }
 0x548   : > { %2101 = vmatprep.subr.bf16.mxu0 %v4866_v10 }
 0x54b   : > { %2102 = vmatpush1.bf16.msra.mxu0 %v4870_v11 }
 0x54c   : > { %2103 = vmatprep.subr.bf16.mxu0 %v4874_v12 }
 0x54f   : > { %2104 = vmatpush1.bf16.msra.mxu0 %v4878_v13 }
 0x550   : > { %2105 = vmatprep.subr.bf16.mxu0 %v4882_v14 }
 0x553   : > { %2106 = vmatpush1.bf16.msra.mxu0 %v4886_v15 }
 0x554   : > { %2107 = vmatprep.subr.bf16.mxu0 %v4890_v16 }
 0x557   : > { %2108 = vmatpush1.bf16.msra.mxu0 %v4894_v17 }
 0x558   : > { %2109 = vmatprep.subr.bf16.mxu0 %v4898_v18 }
 0x55b   : > { %2110 = vmatpush1.bf16.msra.mxu0 %v4902_v19 }
 0x55c   : > { %2111 = vmatprep.subr.bf16.mxu0 %v4906_v20 }
 0x55f   : > { %2112 = vmatpush1.bf16.msra.mxu0 %v4910_v21 }
 0x560   : > { %2113 = vmatprep.subr.bf16.mxu0 %v4914_v22 }
 0x563   : > { %2114 = vmatpush1.bf16.msra.mxu0 %v4918_v23 }
 0x564   : > { %2115 = vmatprep.subr.bf16.mxu0 %v4922_v24 }
 0x567   : > { %2116 = vmatpush1.bf16.msra.mxu0 %v4926_v25 }
 0x568   : > { %2117 = vmatprep.subr.bf16.mxu0 %v4930_v26 }
 0x56b   : > { %2118 = vmatpush1.bf16.msra.mxu0 %v4934_v27 }
 0x56c   : > { %2119 = vmatprep.subr.bf16.mxu0 %v4938_v28 }
 0x56f   : > { %2120 = vmatpush1.bf16.msra.mxu0 %v4942_v29 }
 0x570   : > { %2121 = vmatprep.subr.bf16.mxu0 %v4946_v30 }
 0x573   : > { %2122 = vmatpush1.bf16.msra.mxu0 %v4950_v31 }
 0x574   : > { %2123 = vmatprep.subr.bf16.mxu0 %v4954_v32 }
 0x577   : > { %2124 = vmatpush1.bf16.msra.mxu0 %v4958_v33 }
 0x578   : > { %2125 = vmatprep.subr.bf16.mxu0 %v4963_v40 }
 0x57b   : > { %2126 = vmatpush1.bf16.msra.mxu0 %v4966_v41 }
 0x611   : > { %v1360_v36 = vpop.f32.mrb[8].mxu0 }
 0x612   : > { %v1362_v37 = vpop.f32.mrb[9].mxu0  ;;  %v1367_v43 = vpack.c.bf16 %v1360_v36, %v1360_v36  ;;  %v3819_v36 = vld [vmem:[#allocation11 + $0xd0] ss:$8 sps:$4 sm:$0xff]  }
 0x613   : > { %v1368_v38 = vpack.c.bf16 %v1362_v37, %v1362_v37  ;;  %v1364_v39 = vpop.f32.mrb[10].mxu0  ;;  %v3824_v37 = vld [vmem:[#allocation11 + $0xe4] ss:$8 sps:$4 sm:$0xff]  }
 0x614   : > { %v1365_v44 = vpop.f32.mrb[11].mxu0  ;;  %v3827_v39 = vld [vmem:[#allocation11 + $0xf4] ss:$8 sps:$4 sm:$0xff]  }
 0x615   : > { %1593 = vmatprep.mubr.bf16.mxu1 %v1368_v38  ;;  %v3822_v38 = vld [vmem:[#allocation11 + $0xe0] ss:$8 sps:$4 sm:$0xff]  }
 0x616   : > { %1594 = vmatmul.mubr.bf16.vlgmr.msra.gmra.mrb[4].mxu1 %v1367_v43 }
 0x617   : > { %1797 = vmatpush1.bf16.msra.mxu1 %v3780_v42  ;;  %v3825_v42 = vld [vmem:[#allocation11 + $0xf0] ss:$8 sps:$4 sm:$0xff]  }
 0x618   : > { %1798 = vmatprep.subr.bf16.mxu1 %v3785_v45 }
 0x61b   : > { %1799 = vmatpush1.bf16.msra.mxu1 %v3783_v46 }
 0x61c   : > { %1800 = vmatprep.subr.bf16.mxu1 %v3788_v47 }
 0x61f   : > { %1801 = vmatpush1.bf16.msra.mxu1 %v3786_v48 }
 0x620   : > { %1802 = vmatprep.subr.bf16.mxu1 %v3791_v49  ;;  %v3923_v49 = vld [vmem:[#allocation13 + $0x74] ss:$8 sps:$4 sm:$0xff]  }
 0x623   : > { %1803 = vmatpush1.bf16.msra.mxu1 %v3789_v50 }
 0x624   : > { %1804 = vmatprep.subr.bf16.mxu1 %v3794_v51  ;;  %v3950_v51 = vld [vmem:[%s4808_s19] sm:$0xff] }
 0x627   : > { %1805 = vmatpush1.bf16.msra.mxu1 %v3792_v52 }
 0x628   : > { %1806 = vmatprep.subr.bf16.mxu1 %v3797_v53 }
 0x62b   : > { %1807 = vmatpush1.bf16.msra.mxu1 %v3795_v54  ;;  %v3951_v54 = vld [vmem:[%s4808_s19 + $0x8] sm:$0xff]  ;;  %s3420_s19 = sshll.u32 %s4493_s27, 8 }
 0x62c   : > { %1808 = vmatprep.subr.bf16.mxu1 %v3800_v55 }
 0x62f   : > { %1809 = vmatpush1.bf16.msra.mxu1 %v3798_v56 }
 0x630   : > { %1810 = vmatprep.subr.bf16.mxu1 %v3803_v57 }
 0x633   : > { %1811 = vmatpush1.bf16.msra.mxu1 %v3801_v58 }
 0x634   : > { %1812 = vmatprep.subr.bf16.mxu1 %v3806_v59  ;;  %v3828_v59 = vld [vmem:[#allocation14] ss:$8 sps:$4 sm:$0xff]  }
 0x637   : > { %1813 = vmatpush1.bf16.msra.mxu1 %v3804_v62 }
 0x638   : > { %1814 = vmatprep.subr.bf16.mxu1 %v3809_v63  ;;  %v3833_v63 = vld [vmem:[#allocation14 + $0x14] ss:$8 sps:$4 sm:$0xff]  }
 0x63b   : > { %1815 = vmatpush1.bf16.msra.mxu1 %v3807_v0  ;;  %v3831_v0 = vld [vmem:[#allocation14 + $0x10] ss:$8 sps:$4 sm:$0xff]  }
 0x63c   : > { %1816 = vmatprep.subr.bf16.mxu1 %v3812_v1  ;;  %v3836_v1 = vld [vmem:[#allocation14 + $0x24] ss:$8 sps:$4 sm:$0xff]  }
 0x63f   : > { %1817 = vmatpush1.bf16.msra.mxu1 %v3810_v2 }
 0x640   : > { %1818 = vmatprep.subr.bf16.mxu1 %v3815_v3  ;;  %v3834_v3 = vld [vmem:[#allocation14 + $0x20] ss:$8 sps:$4 sm:$0xff]  }
 0x643   : > { %1819 = vmatpush1.bf16.msra.mxu1 %v3813_v34 }
 0x644   : > { %1820 = vmatprep.subr.bf16.mxu1 %v3818_v60  ;;  %v3839_v60 = vld [vmem:[#allocation14 + $0x34] ss:$8 sps:$4 sm:$0xff]  }
 0x647   : > { %1821 = vmatpush1.bf16.msra.mxu1 %v3816_v61 }
 0x648   : > { %1822 = vmatprep.subr.bf16.mxu1 %v3821_v35  ;;  %v3837_v35 = vld [vmem:[#allocation14 + $0x30] ss:$8 sps:$4 sm:$0xff]  }
 0x64b   : > { %1823 = vmatpush1.bf16.msra.mxu1 %v3819_v36  ;;  %v3842_v36 = vld [vmem:[#allocation14 + $0x44] ss:$8 sps:$4 sm:$0xff]  }
 0x64c   : > { %1824 = vmatprep.subr.bf16.mxu1 %v3824_v37 }
 0x64f   : > { %1825 = vmatpush1.bf16.msra.mxu1 %v3822_v38 }
 0x650   : > { %1826 = vmatprep.subr.bf16.mxu1 %v3827_v39  ;;  %v3840_v39 = vld [vmem:[#allocation14 + $0x40] ss:$8 sps:$4 sm:$0xff]  }
 0x653   : > { %1827 = vmatpush1.bf16.msra.mxu1 %v3825_v42  ;;  %v3845_v42 = vld [vmem:[#allocation14 + $0x54] ss:$8 sps:$4 sm:$0xff]  }
 0x654   : > { %2354 = vmatprep.subr.bf16.mxu1 %v4843_v4  ;;  %v3830_v4 = vld [vmem:[#allocation14 + $0x4] ss:$8 sps:$4 sm:$0xff]  }
 0x6e9   : > { %v1595_v43 = vpop.f32.mrb[4].mxu1 }
 0x6ea   : > { %v1597_v44 = vpop.f32.mrb[5].mxu1  ;;  %v1602_v47 = vpack.c.bf16 %v1595_v43, %v1595_v43 }
 0x6eb   : > { %v1603_v45 = vpack.c.bf16 %v1597_v44, %v1597_v44  ;;  %v1599_v46 = vpop.f32.mrb[6].mxu1  ;;  %v3843_v44 = vld [vmem:[#allocation14 + $0x50] ss:$8 sps:$4 sm:$0xff]  }
 0x6ec   : > { %v1600_v48 = vpop.f32.mrb[7].mxu1 }
 0x6ed   : > { %1828 = vmatprep.mubr.bf16.mxu1 %v1603_v45  ;;  %v3848_v45 = vld [vmem:[#allocation14 + $0x64] ss:$8 sps:$4 sm:$0xff]   ;;  %v3846_v48 = vld [vmem:[#allocation14 + $0x60] ss:$8 sps:$4 sm:$0xff]  }
 0x6ee   : > { %1829 = vmatmul.mubr.bf16.vlgmr.msra.gmra.mrb[8].mxu1 %v1602_v47 }
 0x6ef   : > { %2355 = vmatpush1.bf16.msra.mxu1 %v4846_v5  ;;  %v3852_v5 = vld [vmem:[#allocation13 + $0x80] ss:$8 sps:$4 sm:$0xff]  }
 0x6f0   : > { %2356 = vmatprep.subr.bf16.mxu1 %v4849_v6  ;;  %v3854_v6 = vld [vmem:[#allocation13] ss:$8 sps:$4 sm:$0xff]   ;;  %2063 = vxpose.xlu1.c.b16.start [1/8] %v3852_v5, 128 }
 0x6f1   : > { %2031 = vxpose.xlu0.c.b16.start [1/8] %v3854_v6, 128  ;;  %v3849_v6 = vld [vmem:[#allocation14 + $0x70] ss:$8 sps:$4 sm:$0xff]  }
 0x6f3   : > { %2357 = vmatpush1.bf16.msra.mxu1 %v4854_v7  ;;  %v3859_v7 = vld [vmem:[#allocation13 + $0x90] ss:$8 sps:$4 sm:$0xff]  }
 0x6f4   : > { %2358 = vmatprep.subr.bf16.mxu1 %v4858_v8  ;;  %v3862_v8 = vld [vmem:[#allocation13 + $0x10] ss:$8 sps:$4 sm:$0xff]   ;;  %2064 = vxpose.xlu1.c.b16.cont [2/8] %v3859_v7, 128  ;;  %v3858_v7 = vld [vmem:[#allocation14 + $0x84] ss:$8 sps:$4 sm:$0xff]  }
 0x6f5   : > { %2032 = vxpose.xlu0.c.b16.cont [2/8] %v3862_v8, 128 }
 0x6f7   : > { %2359 = vmatpush1.bf16.msra.mxu1 %v4862_v9  ;;  %v3867_v9 = vld [vmem:[#allocation13 + $0xa0] ss:$8 sps:$4 sm:$0xff]  }
 0x6f8   : > { %2360 = vmatprep.subr.bf16.mxu1 %v4866_v10  ;;  %v3870_v10 = vld [vmem:[#allocation13 + $0x20] ss:$8 sps:$4 sm:$0xff]   ;;  %2065 = vxpose.xlu1.c.b16.cont [3/8] %v3867_v9, 128 }
 0x6f9   : > { %2033 = vxpose.xlu0.c.b16.cont [3/8] %v3870_v10, 128  ;;  %v3856_v10 = vld [vmem:[#allocation14 + $0x80] ss:$8 sps:$4 sm:$0xff]  }
 0x6fb   : > { %2361 = vmatpush1.bf16.msra.mxu1 %v4870_v11  ;;  %v3875_v11 = vld [vmem:[#allocation13 + $0xb0] ss:$8 sps:$4 sm:$0xff]  }
 0x6fc   : > { %2362 = vmatprep.subr.bf16.mxu1 %v4874_v12  ;;  %v3878_v12 = vld [vmem:[#allocation13 + $0x30] ss:$8 sps:$4 sm:$0xff]   ;;  %2066 = vxpose.xlu1.c.b16.cont [4/8] %v3875_v11, 128  ;;  %v3866_v11 = vld [vmem:[#allocation14 + $0x94] ss:$8 sps:$4 sm:$0xff]  }
 0x6fd   : > { %2034 = vxpose.xlu0.c.b16.cont [4/8] %v3878_v12, 128 }
 0x6ff   : > { %2363 = vmatpush1.bf16.msra.mxu1 %v4878_v13  ;;  %v3883_v13 = vld [vmem:[#allocation13 + $0xc0] ss:$8 sps:$4 sm:$0xff]  }
 0x700   : > { %2364 = vmatprep.subr.bf16.mxu1 %v4882_v14  ;;  %v3886_v14 = vld [vmem:[#allocation13 + $0x40] ss:$8 sps:$4 sm:$0xff]   ;;  %2067 = vxpose.xlu1.c.b16.cont [5/8] %v3883_v13, 128  ;;  %v3864_v13 = vld [vmem:[#allocation14 + $0x90] ss:$8 sps:$4 sm:$0xff]  }
 0x701   : > { %2035 = vxpose.xlu0.c.b16.cont [5/8] %v3886_v14, 128  ;;  %v3874_v14 = vld [vmem:[#allocation14 + $0xa4] ss:$8 sps:$4 sm:$0xff]  }
 0x703   : > { %2365 = vmatpush1.bf16.msra.mxu1 %v4886_v15  ;;  %v3891_v15 = vld [vmem:[#allocation13 + $0xd0] ss:$8 sps:$4 sm:$0xff]  }
 0x704   : > { %2366 = vmatprep.subr.bf16.mxu1 %v4890_v16  ;;  %v3894_v16 = vld [vmem:[#allocation13 + $0x50] ss:$8 sps:$4 sm:$0xff]   ;;  %2068 = vxpose.xlu1.c.b16.cont [6/8] %v3891_v15, 128 }
 0x705   : > { %2036 = vxpose.xlu0.c.b16.cont [6/8] %v3894_v16, 128  ;;  %v3872_v16 = vld [vmem:[#allocation14 + $0xa0] ss:$8 sps:$4 sm:$0xff]  }
 0x707   : > { %2367 = vmatpush1.bf16.msra.mxu1 %v4894_v17  ;;  %v3899_v17 = vld [vmem:[#allocation13 + $0xe0] ss:$8 sps:$4 sm:$0xff]  }
 0x708   : > { %2368 = vmatprep.subr.bf16.mxu1 %v4898_v18  ;;  %v3902_v18 = vld [vmem:[#allocation13 + $0x60] ss:$8 sps:$4 sm:$0xff]   ;;  %2069 = vxpose.xlu1.c.b16.cont [7/8] %v3899_v17, 128 }
 0x709   : > { %2037 = vxpose.xlu0.c.b16.cont [7/8] %v3902_v18, 128  ;;  %v3882_v18 = vld [vmem:[#allocation14 + $0xb4] ss:$8 sps:$4 sm:$0xff]  }
 0x70b   : > { %2369 = vmatpush1.bf16.msra.mxu1 %v4902_v19  ;;  %v3907_v19 = vld [vmem:[#allocation13 + $0xf0] ss:$8 sps:$4 sm:$0xff]  }
 0x70c   : > { %2370 = vmatprep.subr.bf16.mxu1 %v4906_v20  ;;  %v3910_v20 = vld [vmem:[#allocation13 + $0x70] ss:$8 sps:$4 sm:$0xff]   ;;  %2070 = vxpose.xlu1.c.b16.end [8/8] %v3907_v19, 128 }
 0x70d   : > { %2038 = vxpose.xlu0.c.b16.end [8/8] %v3910_v20, 128  ;;  %v3880_v19 = vld [vmem:[#allocation14 + $0xb0] ss:$8 sps:$4 sm:$0xff]  }
 0x70f   : > { %2371 = vmatpush1.bf16.msra.mxu1 %v4910_v21  ;;  %v3915_v21 = vld [vmem:[#allocation13 + $0x84] ss:$8 sps:$4 sm:$0xff]  }
 0x710   : > { %2372 = vmatprep.subr.bf16.mxu1 %v4914_v22  ;;  %v3861_v22 = vld [vmem:[#allocation13 + $0x94] ss:$8 sps:$4 sm:$0xff]   ;;  %2079 = vxpose.xlu1.c.b16.start [1/8] %v3915_v21, 128  ;;  %v3890_v21 = vld [vmem:[#allocation14 + $0xc4] ss:$8 sps:$4 sm:$0xff]  }
 0x713   : > { %2373 = vmatpush1.bf16.msra.mxu1 %v4918_v23  ;;  %v3869_v23 = vld [vmem:[#allocation13 + $0xa4] ss:$8 sps:$4 sm:$0xff]  }
 0x714   : > { %2374 = vmatprep.subr.bf16.mxu1 %v4922_v24  ;;  %2080 = vxpose.xlu1.c.b16.cont [2/8] %v3861_v22, 128  ;;  %v3877_v24 = vld [vmem:[#allocation13 + $0xb4] ss:$8 sps:$4 sm:$0xff]  }
 0x717   : > { %2375 = vmatpush1.bf16.msra.mxu1 %v4926_v25  ;;  %v3885_v25 = vld [vmem:[#allocation13 + $0xc4] ss:$8 sps:$4 sm:$0xff]  }
 0x718   : > { %2376 = vmatprep.subr.bf16.mxu1 %v4930_v26  ;;  %2081 = vxpose.xlu1.c.b16.cont [3/8] %v3869_v23, 128  ;;  %v3893_v26 = vld [vmem:[#allocation13 + $0xd4] ss:$8 sps:$4 sm:$0xff]   ;;  %v3888_v23 = vld [vmem:[#allocation14 + $0xc0] ss:$8 sps:$4 sm:$0xff]  }
 0x71b   : > { %2377 = vmatpush1.bf16.msra.mxu1 %v4934_v27  ;;  %v3901_v27 = vld [vmem:[#allocation13 + $0xe4] ss:$8 sps:$4 sm:$0xff]  }
 0x71c   : > { %2378 = vmatprep.subr.bf16.mxu1 %v4938_v28  ;;  %2082 = vxpose.xlu1.c.b16.cont [4/8] %v3877_v24, 128  ;;  %v3909_v28 = vld [vmem:[#allocation13 + $0xf4] ss:$8 sps:$4 sm:$0xff]  }
 0x71f   : > { %2379 = vmatpush1.bf16.msra.mxu1 %v4942_v29  ;;  %v3916_v29 = vld [vmem:[#allocation13 + $0x4] ss:$8 sps:$4 sm:$0xff]  }
 0x720   : > { %2380 = vmatprep.subr.bf16.mxu1 %v4946_v30  ;;  %2083 = vxpose.xlu1.c.b16.cont [5/8] %v3885_v25, 128  ;;  %v3917_v30 = vld [vmem:[#allocation13 + $0x14] ss:$8 sps:$4 sm:$0xff]  }
 0x721   : > { %v3898_v25 = vld [vmem:[#allocation14 + $0xd4] ss:$8 sps:$4 sm:$0xff]  }
 0x723   : > { %2381 = vmatpush1.bf16.msra.mxu1 %v4950_v31  ;;  %v3918_v31 = vld [vmem:[#allocation13 + $0x24] ss:$8 sps:$4 sm:$0xff]  }
 0x724   : > { %2382 = vmatprep.subr.bf16.mxu1 %v4954_v32  ;;  %2084 = vxpose.xlu1.c.b16.cont [6/8] %v3893_v26, 128  ;;  %v3919_v32 = vld [vmem:[#allocation13 + $0x34] ss:$8 sps:$4 sm:$0xff]   ;;  %v3896_v26 = vld [vmem:[#allocation14 + $0xd0] ss:$8 sps:$4 sm:$0xff]  }
 0x727   : > { %2383 = vmatpush1.bf16.msra.mxu1 %v4958_v33  ;;  %v3920_v33 = vld [vmem:[#allocation13 + $0x44] ss:$8 sps:$4 sm:$0xff]  }
 0x728   : > { %2384 = vmatprep.subr.bf16.mxu1 %v4963_v40  ;;  %2085 = vxpose.xlu1.c.b16.cont [7/8] %v3901_v27, 128  ;;  %v3921_v40 = vld [vmem:[#allocation13 + $0x54] ss:$8 sps:$4 sm:$0xff]  }
 0x72b   : > { %2385 = vmatpush1.bf16.msra.mxu1 %v4966_v41  ;;  %v3922_v41 = vld [vmem:[#allocation13 + $0x64] ss:$8 sps:$4 sm:$0xff]  }
 0x72c   : > { %2589 = vmatprep.subr.bf16.mxu1 %v3830_v4  ;;  %2086 = vxpose.xlu1.c.b16.end [8/8] %v3909_v28, 128  ;;  %v3851_v4 = vld [vmem:[#allocation14 + $0x74] ss:$8 sps:$4 sm:$0xff]   ;;  %v3906_v28 = vld [vmem:[#allocation14 + $0xe4] ss:$8 sps:$4 sm:$0xff]  }
 0x730   : > { %2047 = vxpose.xlu1.c.b16.start [1/8] %v3916_v29, 128 }
 0x734   : > { %2048 = vxpose.xlu1.c.b16.cont [2/8] %v3917_v30, 128  ;;  %v3904_v30 = vld [vmem:[#allocation14 + $0xe0] ss:$8 sps:$4 sm:$0xff]  }
 0x738   : > { %2049 = vxpose.xlu1.c.b16.cont [3/8] %v3918_v31, 128 }
 0x73c   : > { %2050 = vxpose.xlu1.c.b16.cont [4/8] %v3919_v32, 128  ;;  %v3914_v32 = vld [vmem:[#allocation14 + $0xf4] ss:$8 sps:$4 sm:$0xff]  }
 0x740   : > { %2051 = vxpose.xlu1.c.b16.cont [5/8] %v3920_v33, 128  ;;  %v3912_v33 = vld [vmem:[#allocation14 + $0xf0] ss:$8 sps:$4 sm:$0xff]  }
 0x744   : > { %2052 = vxpose.xlu1.c.b16.cont [6/8] %v3921_v40, 128 }
 0x748   : > { %2053 = vxpose.xlu1.c.b16.cont [7/8] %v3922_v41, 128 }
 0x74c   : > { %2054 = vxpose.xlu1.c.b16.end [8/8] %v3923_v49, 128 }
 0x756   : > { %v2071_v2 = vpop.trf.xlu1 }
 0x757   : > { %2127 = vmatprep.mubr.bf16.mxu0 %v2071_v2  ;;  %v2039_v34 = vpop.trf.xlu0 }
 0x758   : > { %2128 = vmatmul.mubr.bf16.vlgmr.msra.gmra.mrb[12].mxu0 %v2039_v34  ;;  %v3934_v34 = vld [vmem:[#allocation16 + $0x68] sm:$0xff]  }
 0x75a   : > { %v2072_v61 = vpop.trf.xlu1 }
 0x75b   : > { %2137 = vmatprep.mubr.bf16.mxu0 %v2072_v61  ;;  %v2040_v37 = vpop.trf.xlu0  ;;  %v3936_v61 = vld [vmem:[#allocation16 + $0x70] sm:$0xff]  }
 0x75e   : > { %v2073_v38 = vpop.trf.xlu1 }
 0x75f   : > { %v2041_v46 = vpop.trf.xlu0 }
 0x760   : > { %2138 = vmatmul.mubr.bf16.gmra.mrb[16].mxu0 %v2040_v37  ;;  %v3937_v37 = vld [vmem:[#allocation16 + $0x30] sm:$0xff]  }
 0x761   : > { %2147 = vmatprep.mubr.bf16.mxu0 %v2073_v38  ;;  %v3938_v38 = vld [vmem:[#allocation16 + $0x78] sm:$0xff]  }
 0x762   : > { %v2074_v43 = vpop.trf.xlu1 }
 0x763   : > { %v2042_v8 = vpop.trf.xlu0 }
 0x766   : > { %v2075_v47 = vpop.trf.xlu1 }
 0x767   : > { %v2043_v15 = vpop.trf.xlu0 }
 0x768   : > { %2148 = vmatmul.mubr.bf16.gmra.mrb[20].mxu0 %v2041_v46 }
 0x769   : > { %2157 = vmatprep.mubr.bf16.mxu0 %v2074_v43 }
 0x76a   : > { %v2076_v5 = vpop.trf.xlu1 }
 0x76b   : > { %v2044_v22 = vpop.trf.xlu0 }
 0x76e   : > { %v2077_v9 = vpop.trf.xlu1 }
 0x76f   : > { %v2045_v29 = vpop.trf.xlu0 }
 0x770   : > { %2158 = vmatmul.mubr.bf16.gmra.mrb[24].mxu0 %v2042_v8 }
 0x771   : > { %2167 = vmatprep.mubr.bf16.mxu0 %v2075_v47 }
 0x772   : > { %v2078_v12 = vpop.trf.xlu1 }
 0x773   : > { %v2046_v41 = vpop.trf.xlu0 }
 0x776   : > { %v2087_v17 = vpop.trf.xlu1 }
 0x778   : > { %2168 = vmatmul.mubr.bf16.gmra.mrb[28].mxu0 %v2043_v15 }
 0x779   : > { %2177 = vmatprep.mubr.bf16.mxu0 %v2076_v5 }
 0x77a   : > { %v2088_v20 = vpop.trf.xlu1 }
 0x77e   : > { %v2089_v24 = vpop.trf.xlu1 }
 0x780   : > { %2178 = vmatmul.mubr.bf16.gmra.mrb[32].mxu0 %v2044_v22 }
 0x781   : > { %2187 = vmatprep.mubr.bf16.mxu0 %v2077_v9 }
 0x782   : > { %v2090_v27 = vpop.trf.xlu1 }
 0x786   : > { %v2091_v31 = vpop.trf.xlu1 }
 0x788   : > { %2188 = vmatmul.mubr.bf16.gmra.mrb[36].mxu0 %v2045_v29 }
 0x789   : > { %2197 = vmatprep.mubr.bf16.mxu0 %v2078_v12 }
 0x78a   : > { %v2092_v40 = vpop.trf.xlu1 }
 0x78e   : > { %v2093_v49 = vpop.trf.xlu1 }
 0x790   : > { %2198 = vmatmul.mubr.bf16.gmra.mrb[40].mxu0 %v2046_v41 }
 0x791   : > { %2207 = vmatprep.mubr.bf16.mxu0 %v2087_v17 }
 0x7c1   : > { %v1830_v50 = vpop.f32.mrb[8].mxu1 }
 0x7c2   : > { %v1831_v52 = vadd.f32 %v3950_v51, %v1830_v50  ;;  %v1832_v53 = vpop.f32.mrb[9].mxu1  ;;  %v2094_v50 = vpop.trf.xlu1 }
 0x7c3   : > { %v1833_v55 = vadd.f32 %v3951_v54, %v1832_v53  ;;  %v1834_v56 = vpop.f32.mrb[10].mxu1  ;;  %v3924_v54 = vld [vmem:[#allocation16 + $0x40] sm:$0xff]  }
 0x7c4   : > { %1837 = vst [vmem:[%s5077_s13] sm:$0xff] %v1831_v52  ;;  %v1835_v57 = vpop.f32.mrb[11].mxu1  ;;  %v5081_v62 = vpack.c.bf16 %v1831_v52, %v1831_v52  ;;  %v3926_v56 = vld [vmem:[#allocation16 + $0x48] sm:$0xff]  }
 0x7c5   : > { %1838 = vst [vmem:[%s5077_s13 + $0x8] sm:$0xff] %v1833_v55  ;;  %v2353_v58 = vpack.c.bf16 %v1833_v55, %v1833_v55  ;;  %v3925_v55 = vld [vmem:[#allocation16] sm:$0xff]   ;;  %v3927_v57 = vld [vmem:[#allocation16 + $0x8] sm:$0xff]  }
 0x7c6   : > { %v2055_v51 = vpop.trf.xlu1 }
 0x7c7   : > { %2386 = vmatprep.mubr.bf16.mxu1 %v2353_v58  ;;  %2208 = vmatmul.mubr.bf16.gmra.mrb[44].mxu0 %v2055_v51 }
 0x7c8   : > { %2387 = vmatmul.mubr.bf16.vlgmr.msra.gmra.mrb[12].mxu1 %v5081_v62  ;;  %2217 = vmatprep.mubr.bf16.mxu0 %v2088_v20 }
 0x7c9   : > { %2590 = vmatpush1.bf16.msra.mxu1 %v3828_v59  ;;  %2621 = vmatprep.mubr.bf16.mxu1 %v2353_v58  ;;  %v3928_v58 = vld [vmem:[#allocation16 + $0x50] sm:$0xff]  }
 0x7ca   : > { %2591 = vmatprep.subr.bf16.mxu1 %v3833_v63  ;;  %v2056_v52 = vpop.trf.xlu1  ;;  %v3930_v63 = vld [vmem:[#allocation16 + $0x58] sm:$0xff]  }
 0x7cd   : > { %2592 = vmatpush1.bf16.msra.mxu1 %v3831_v0  ;;  %v3931_v0 = vld [vmem:[#allocation16 + $0x18] sm:$0xff]  }
 0x7ce   : > { %2593 = vmatprep.subr.bf16.mxu1 %v3836_v1  ;;  %v2057_v53 = vpop.trf.xlu1  ;;  %v3932_v1 = vld [vmem:[#allocation16 + $0x60] sm:$0xff]  }
 0x7cf   : > { %2218 = vmatmul.mubr.bf16.gmra.mrb[48].mxu0 %v2056_v52 }
 0x7d0   : > { %2227 = vmatprep.mubr.bf16.mxu0 %v2089_v24 }
 0x7d1   : > { %2594 = vmatpush1.bf16.msra.mxu1 %v3834_v3  ;;  %v3933_v3 = vld [vmem:[#allocation16 + $0x20] sm:$0xff]  }
 0x7d2   : > { %2595 = vmatprep.subr.bf16.mxu1 %v3839_v60  ;;  %v2058_v59 = vpop.trf.xlu1  ;;  %v3935_v60 = vld [vmem:[#allocation16 + $0x28] sm:$0xff]  }
 0x7d5   : > { %2596 = vmatpush1.bf16.msra.mxu1 %v3837_v35 }
 0x7d6   : > { %2597 = vmatprep.subr.bf16.mxu1 %v3842_v36  ;;  %v2059_v2 = vpop.trf.xlu1 }
 0x7d7   : > { %2228 = vmatmul.mubr.bf16.gmra.mrb[52].mxu0 %v2057_v53 }
 0x7d8   : > { %2237 = vmatprep.mubr.bf16.mxu0 %v2090_v27 }
 0x7d9   : > { %2598 = vmatpush1.bf16.msra.mxu1 %v3840_v39  ;;  %v3939_v39 = vld [vmem:[#allocation16 + $0x38] sm:$0xff]  }
 0x7da   : > { %2599 = vmatprep.subr.bf16.mxu1 %v3845_v42  ;;  %v2060_v35 = vpop.trf.xlu1 }
 0x7dd   : > { %2600 = vmatpush1.bf16.msra.mxu1 %v3843_v44 }
 0x7de   : > { %2601 = vmatprep.subr.bf16.mxu1 %v3848_v45  ;;  %v2061_v36 = vpop.trf.xlu1 }
 0x7df   : > { %2238 = vmatmul.mubr.bf16.gmra.mrb[56].mxu0 %v2058_v59 }
 0x7e0   : > { %2247 = vmatprep.mubr.bf16.mxu0 %v2091_v31 }
 0x7e1   : > { %2602 = vmatpush1.bf16.msra.mxu1 %v3846_v48 }
 0x7e2   : > { %2603 = vmatprep.subr.bf16.mxu1 %v3851_v4  ;;  %v2062_v42 = vpop.trf.xlu1 }
 0x7e5   : > { %2604 = vmatpush1.bf16.msra.mxu1 %v3849_v6 }
 0x7e6   : > { %2605 = vmatprep.subr.bf16.mxu1 %v3858_v7 }
 0x7e7   : > { %2248 = vmatmul.mubr.bf16.gmra.mrb[60].mxu0 %v2059_v2 }
 0x7e8   : > { %2257 = vmatprep.mubr.bf16.mxu0 %v2092_v40 }
 0x7e9   : > { %2606 = vmatpush1.bf16.msra.mxu1 %v3856_v10 }
 0x7ea   : > { %2607 = vmatprep.subr.bf16.mxu1 %v3866_v11 }
 0x7ed   : > { %2608 = vmatpush1.bf16.msra.mxu1 %v3864_v13 }
 0x7ee   : > { %2609 = vmatprep.subr.bf16.mxu1 %v3874_v14 }
 0x7ef   : > { %2258 = vmatmul.mubr.bf16.gmra.mrb[64].mxu0 %v2060_v35 }
 0x7f0   : > { %2267 = vmatprep.mubr.bf16.mxu0 %v2093_v49 }
 0x7f1   : > { %2610 = vmatpush1.bf16.msra.mxu1 %v3872_v16 }
 0x7f2   : > { %2611 = vmatprep.subr.bf16.mxu1 %v3882_v18 }
 0x7f5   : > { %2612 = vmatpush1.bf16.msra.mxu1 %v3880_v19 }
 0x7f6   : > { %2613 = vmatprep.subr.bf16.mxu1 %v3890_v21 }
 0x7f7   : > { %2268 = vmatmul.mubr.bf16.gmra.mrb[68].mxu0 %v2061_v36 }
 0x7f8   : > { %2277 = vmatprep.mubr.bf16.mxu0 %v2094_v50 }
 0x7f9   : > { %2614 = vmatpush1.bf16.msra.mxu1 %v3888_v23 }
 0x7fa   : > { %2615 = vmatprep.subr.bf16.mxu1 %v3898_v25 }
 0x7fd   : > { %2616 = vmatpush1.bf16.msra.mxu1 %v3896_v26 }
 0x7fe   : > { %2617 = vmatprep.subr.bf16.mxu1 %v3906_v28 }
 0x7ff   : > { %2278 = vmatmul.mubr.bf16.gmra.mrb[72].mxu0 %v2062_v42 }
 0x801   : > { %2618 = vmatpush1.bf16.msra.mxu1 %v3904_v30 }
 0x802   : > { %2619 = vmatprep.subr.bf16.mxu1 %v3914_v32 }
 0x805   : > { %2620 = vmatpush1.bf16.msra.mxu1 %v3912_v33 }
 0x806   : > { %3423 = vmatprep.subr.bf16.mxu1 %v3924_v54 }
 0x808   : > { %2622 = vmatmul.mubr.bf16.vlgmr.msra.gmra.mrb[16].mxu1 %v5081_v62  ;;  %v3929_v62 = vld [vmem:[#allocation16 + $0x10] sm:$0xff]  }
 0x809   : > { %3424 = vmatpush3.bf16.msra.mxu1 %v3925_v55 }
 0x80a   : > { %3425 = vmatprep.subr.bf16.mxu1 %v3926_v56 }
 0x80d   : > { %3426 = vmatpush3.bf16.msra.mxu1 %v3927_v57 }
 0x80e   : > { %3427 = vmatprep.subr.bf16.mxu1 %v3928_v58 }
 0x811   : > { %3428 = vmatpush3.bf16.msra.mxu1 %v3929_v62 }
 0x812   : > { %3429 = vmatprep.subr.bf16.mxu1 %v3930_v63 }
 0x815   : > { %3430 = vmatpush3.bf16.msra.mxu1 %v3931_v0 }
 0x816   : > { %3431 = vmatprep.subr.bf16.mxu1 %v3932_v1 }
 0x819   : > { %3432 = vmatpush3.bf16.msra.mxu1 %v3933_v3 }
 0x81a   : > { %3433 = vmatprep.subr.bf16.mxu1 %v3934_v34 }
 0x81d   : > { %3434 = vmatpush3.bf16.msra.mxu1 %v3935_v60 }
 0x81e   : > { %3435 = vmatprep.subr.bf16.mxu1 %v3936_v61 }
 0x821   : > { %3436 = vmatpush3.bf16.msra.mxu1 %v3937_v37 }
 0x822   : > { %3437 = vmatprep.subr.bf16.mxu1 %v3938_v38 }
 0x825   : > { %3438 = vmatpush3.bf16.msra.mxu1 %v3939_v39 }
 0x82b   : > { %v2129_v47 = vpop.f32.mrb[12].mxu0 }
 0x82c   : > { %2288 = vst [vmem:[%s5091_s9] sm:$0xff] %v2129_v47  ;;  %v2131_v48 = vpop.f32.mrb[13].mxu0 }
 0x82d   : > { %2289 = vst [vmem:[%s5091_s9 + $0x8] sm:$0xff] %v2131_v48  ;;  %v2133_v4 = vpop.f32.mrb[14].mxu0 }
 0x82e   : > { %2290 = vst [vmem:[%s5091_s9 + $0x10] sm:$0xff] %v2133_v4  ;;  %v2135_v5 = vpop.f32.mrb[15].mxu0 }
 0x82f   : > { %2291 = vst [vmem:[%s5091_s9 + $0x18] sm:$0xff] %v2135_v5 }
 0x833   : > { %v2139_v6 = vpop.f32.mrb[16].mxu0 }
 0x834   : > { %2292 = vst [vmem:[%s5091_s9 + $0x20] sm:$0xff] %v2139_v6  ;;  %v2141_v7 = vpop.f32.mrb[17].mxu0 }
 0x835   : > { %2293 = vst [vmem:[%s5091_s9 + $0x28] sm:$0xff] %v2141_v7  ;;  %v2143_v8 = vpop.f32.mrb[18].mxu0 }
 0x836   : > { %2294 = vst [vmem:[%s5091_s9 + $0x30] sm:$0xff] %v2143_v8  ;;  %v2145_v9 = vpop.f32.mrb[19].mxu0 }
 0x837   : > { %2295 = vst [vmem:[%s5091_s9 + $0x38] sm:$0xff] %v2145_v9 }
 0x83b   : > { %v2149_v10 = vpop.f32.mrb[20].mxu0 }
 0x83c   : > { %2296 = vst [vmem:[%s5091_s9 + $0x40] sm:$0xff] %v2149_v10  ;;  %v2151_v11 = vpop.f32.mrb[21].mxu0 }
 0x83d   : > { %2297 = vst [vmem:[%s5091_s9 + $0x48] sm:$0xff] %v2151_v11  ;;  %v2153_v12 = vpop.f32.mrb[22].mxu0 }
 0x83e   : > { %2298 = vst [vmem:[%s5091_s9 + $0x50] sm:$0xff] %v2153_v12  ;;  %v2155_v13 = vpop.f32.mrb[23].mxu0 }
 0x83f   : > { %2299 = vst [vmem:[%s5091_s9 + $0x58] sm:$0xff] %v2155_v13 }
 0x843   : > { %v2159_v14 = vpop.f32.mrb[24].mxu0 }
 0x844   : > { %2300 = vst [vmem:[%s5091_s9 + $0x60] sm:$0xff] %v2159_v14  ;;  %v2161_v15 = vpop.f32.mrb[25].mxu0 }
 0x845   : > { %2301 = vst [vmem:[%s5091_s9 + $0x68] sm:$0xff] %v2161_v15  ;;  %v2163_v16 = vpop.f32.mrb[26].mxu0 }
 0x846   : > { %2302 = vst [vmem:[%s5091_s9 + $0x70] sm:$0xff] %v2163_v16  ;;  %v2165_v17 = vpop.f32.mrb[27].mxu0 }
 0x847   : > { %2303 = vst [vmem:[%s5091_s9 + $0x78] sm:$0xff] %v2165_v17 }
 0x84b   : > { %v2169_v18 = vpop.f32.mrb[28].mxu0 }
 0x84c   : > { %2304 = vst [vmem:[%s5091_s9 + $0x80] sm:$0xff] %v2169_v18  ;;  %v2171_v19 = vpop.f32.mrb[29].mxu0 }
 0x84d   : > { %2305 = vst [vmem:[%s5091_s9 + $0x88] sm:$0xff] %v2171_v19  ;;  %v2173_v20 = vpop.f32.mrb[30].mxu0 }
 0x84e   : > { %2306 = vst [vmem:[%s5091_s9 + $0x90] sm:$0xff] %v2173_v20  ;;  %v2175_v21 = vpop.f32.mrb[31].mxu0 }
 0x84f   : > { %2307 = vst [vmem:[%s5091_s9 + $0x98] sm:$0xff] %v2175_v21 }
 0x853   : > { %v2179_v22 = vpop.f32.mrb[32].mxu0 }
 0x854   : > { %2308 = vst [vmem:[%s5091_s9 + $0xa0] sm:$0xff] %v2179_v22  ;;  %v2181_v23 = vpop.f32.mrb[33].mxu0 }
 0x855   : > { %2309 = vst [vmem:[%s5091_s9 + $0xa8] sm:$0xff] %v2181_v23  ;;  %v2183_v24 = vpop.f32.mrb[34].mxu0 }
 0x856   : > { %2310 = vst [vmem:[%s5091_s9 + $0xb0] sm:$0xff] %v2183_v24  ;;  %v2185_v25 = vpop.f32.mrb[35].mxu0 }
 0x857   : > { %2311 = vst [vmem:[%s5091_s9 + $0xb8] sm:$0xff] %v2185_v25 }
 0x85b   : > { %v2189_v26 = vpop.f32.mrb[36].mxu0 }
 0x85c   : > { %2312 = vst [vmem:[%s5091_s9 + $0xc0] sm:$0xff] %v2189_v26  ;;  %v2191_v27 = vpop.f32.mrb[37].mxu0 }
 0x85d   : > { %2313 = vst [vmem:[%s5091_s9 + $0xc8] sm:$0xff] %v2191_v27  ;;  %v2193_v28 = vpop.f32.mrb[38].mxu0 }
 0x85e   : > { %2314 = vst [vmem:[%s5091_s9 + $0xd0] sm:$0xff] %v2193_v28  ;;  %v2195_v29 = vpop.f32.mrb[39].mxu0 }
 0x85f   : > { %2315 = vst [vmem:[%s5091_s9 + $0xd8] sm:$0xff] %v2195_v29 }
 0x863   : > { %v2199_v30 = vpop.f32.mrb[40].mxu0 }
 0x864   : > { %2316 = vst [vmem:[%s5091_s9 + $0xe0] sm:$0xff] %v2199_v30  ;;  %v2201_v31 = vpop.f32.mrb[41].mxu0 }
 0x865   : > { %2317 = vst [vmem:[%s5091_s9 + $0xe8] sm:$0xff] %v2201_v31  ;;  %v2203_v33 = vpop.f32.mrb[42].mxu0 }
 0x866   : > { %2318 = vst [vmem:[%s5091_s9 + $0xf0] sm:$0xff] %v2203_v33  ;;  %v2205_v49 = vpop.f32.mrb[43].mxu0 }
 0x867   : > { %2319 = vst [vmem:[%s5091_s9 + $0xf8] sm:$0xff] %v2205_v49 }
 0x89a   : > { %v2209_v55 = vpop.f32.mrb[44].mxu0 }
 0x89b   : > { %v2388_v43 = vpop.f32.mrb[12].mxu1  ;;  %2320 = vst [vmem:[%s5091_s9 + $0x100] sm:$0xff] %v2209_v55  ;;  %v2211_v56 = vpop.f32.mrb[45].mxu0 }
 0x89c   : > { %2395 = vst [vmem:[%s5086_s20] sm:$0xff] %v2388_v43  ;;  %v2390_v44 = vpop.f32.mrb[13].mxu1  ;;  %2321 = vst [vmem:[%s5091_s9 + $0x108] sm:$0xff] %v2211_v56  ;;  %v2213_v57 = vpop.f32.mrb[46].mxu0 }
 0x89d   : > { %2396 = vst [vmem:[%s5086_s20 + $0x8] sm:$0xff] %v2390_v44  ;;  %v2392_v45 = vpop.f32.mrb[14].mxu1  ;;  %2322 = vst [vmem:[%s5091_s9 + $0x110] sm:$0xff] %v2213_v57  ;;  %v2215_v58 = vpop.f32.mrb[47].mxu0  ;;  %s4401_s20 = smov [#allocation18]  }
 0x89e   : > { %v2393_v46 = vpop.f32.mrb[15].mxu1  ;;  %2323 = vst [vmem:[%s5091_s9 + $0x118] sm:$0xff] %v2215_v58  ;;  %s4212_s18 = sshll.u32 %s4401_s20, 4  ;;  %s4213_s18 = int_to_ptr.vmem [resolvable:$false] %s4212_s18 }
 0x89f   : > { %s4214_s11 = scalar_lea.vmem %s4213_s18, 16384  ;;  %p4215_p4 = scmp.lt.s32.totalorder %s5165_s29, %s4213_s18 }
 0x8a0   : > { %p4216_p8 = scmp.lt.s32.totalorder %s4214_s11, %s4208_s15 }
 0x8a2   : > { %v2219_v59 = vpop.f32.mrb[48].mxu0  ;;  %p4217_p11 = por %p4216_p8, %p4215_p4 }
 0x8a3   : > { %2324 = vst [vmem:[%s5091_s9 + $0x120] sm:$0xff] %v2219_v59  ;;  %v2221_v62 = vpop.f32.mrb[49].mxu0 }
 0x8a4   : > { %2325 = vst [vmem:[%s5091_s9 + $0x128] sm:$0xff] %v2221_v62  ;;  %v2223_v63 = vpop.f32.mrb[50].mxu0  ;;  %p4218_p3 = pnand %p4217_p11, %p4211_p9 }
 0x8a5   : > { %2326 = vst [vmem:[%s5091_s9 + $0x130] sm:$0xff] %v2223_v63  ;;  %v2225_v0 = vpop.f32.mrb[51].mxu0 }
 0x8a6   : > { %2327 = vst [vmem:[%s5091_s9 + $0x138] sm:$0xff] %v2225_v0 }
 0x8aa   : > { %v2229_v1 = vpop.f32.mrb[52].mxu0 }
 0x8ab   : > { %2328 = vst [vmem:[%s5091_s9 + $0x140] sm:$0xff] %v2229_v1  ;;  %v2231_v2 = vpop.f32.mrb[53].mxu0 }
 0x8ac   : > { %2329 = vst [vmem:[%s5091_s9 + $0x148] sm:$0xff] %v2231_v2  ;;  %v2233_v3 = vpop.f32.mrb[54].mxu0 }
 0x8ad   : > { %2330 = vst [vmem:[%s5091_s9 + $0x150] sm:$0xff] %v2233_v3  ;;  %v2235_v34 = vpop.f32.mrb[55].mxu0 }
 0x8ae   : > { %2331 = vst [vmem:[%s5091_s9 + $0x158] sm:$0xff] %v2235_v34 }
 0x8b2   : > { %v2239_v60 = vpop.f32.mrb[56].mxu0 }
 0x8b3   : > { %2332 = vst [vmem:[%s5091_s9 + $0x160] sm:$0xff] %v2239_v60  ;;  %v2241_v61 = vpop.f32.mrb[57].mxu0 }
 0x8b4   : > { %2333 = vst [vmem:[%s5091_s9 + $0x168] sm:$0xff] %v2241_v61  ;;  %v2243_v35 = vpop.f32.mrb[58].mxu0 }
 0x8b5   : > { %2334 = vst [vmem:[%s5091_s9 + $0x170] sm:$0xff] %v2243_v35  ;;  %v2245_v36 = vpop.f32.mrb[59].mxu0 }
 0x8b6   : > { %2335 = vst [vmem:[%s5091_s9 + $0x178] sm:$0xff] %v2245_v36 }
 0x8ba   : > { %v2249_v37 = vpop.f32.mrb[60].mxu0 }
 0x8bb   : > { %2336 = vst [vmem:[%s5091_s9 + $0x180] sm:$0xff] %v2249_v37  ;;  %v2251_v38 = vpop.f32.mrb[61].mxu0 }
 0x8bc   : > { %2337 = vst [vmem:[%s5091_s9 + $0x188] sm:$0xff] %v2251_v38  ;;  %v2253_v39 = vpop.f32.mrb[62].mxu0 }
 0x8bd   : > { %2338 = vst [vmem:[%s5091_s9 + $0x190] sm:$0xff] %v2253_v39  ;;  %v2255_v42 = vpop.f32.mrb[63].mxu0 }
 0x8be   : > { %2339 = vst [vmem:[%s5091_s9 + $0x198] sm:$0xff] %v2255_v42 }
 0x8c2   : > { %v2259_v43 = vpop.f32.mrb[64].mxu0 }
 0x8c3   : > { %2340 = vst [vmem:[%s5091_s9 + $0x1a0] sm:$0xff] %v2259_v43  ;;  %v2261_v44 = vpop.f32.mrb[65].mxu0 }
 0x8c4   : > { %2341 = vst [vmem:[%s5091_s9 + $0x1a8] sm:$0xff] %v2261_v44  ;;  %v2263_v45 = vpop.f32.mrb[66].mxu0 }
 0x8c5   : > { %2342 = vst [vmem:[%s5091_s9 + $0x1b0] sm:$0xff] %v2263_v45  ;;  %v2265_v46 = vpop.f32.mrb[67].mxu0 }
 0x8c6   : > { %2343 = vst [vmem:[%s5091_s9 + $0x1b8] sm:$0xff] %v2265_v46 }
 0x8ca   : > { %v2269_v47 = vpop.f32.mrb[68].mxu0 }
 0x8cb   : > { %2344 = vst [vmem:[%s5091_s9 + $0x1c0] sm:$0xff] %v2269_v47  ;;  %v2271_v48 = vpop.f32.mrb[69].mxu0 }
 0x8cc   : > { %2345 = vst [vmem:[%s5091_s9 + $0x1c8] sm:$0xff] %v2271_v48  ;;  %v2273_v4 = vpop.f32.mrb[70].mxu0 }
 0x8cd   : > { %2346 = vst [vmem:[%s5091_s9 + $0x1d0] sm:$0xff] %v2273_v4  ;;  %v2275_v5 = vpop.f32.mrb[71].mxu0 }
 0x8ce   : > { %2347 = vst [vmem:[%s5091_s9 + $0x1d8] sm:$0xff] %v2275_v5 }
 0x8d2   : > { %v2279_v6 = vpop.f32.mrb[72].mxu0 }
 0x8d3   : > { %2348 = vst [vmem:[%s5091_s9 + $0x1e0] sm:$0xff] %v2279_v6  ;;  %v2281_v7 = vpop.f32.mrb[73].mxu0 }
 0x8d4   : > { %2349 = vst [vmem:[%s5091_s9 + $0x1e8] sm:$0xff] %v2281_v7  ;;  %v2283_v8 = vpop.f32.mrb[74].mxu0 }
 0x8d5   : > { %2350 = vst [vmem:[%s5091_s9 + $0x1f0] sm:$0xff] %v2283_v8  ;;  %v2285_v9 = vpop.f32.mrb[75].mxu0 }
 0x8d6   : > { %2351 = vst [vmem:[%s5091_s9 + $0x1f8] sm:$0xff] %v2285_v9 }
 0x8db   : > { %v2623_v32 = vpop.f32.mrb[16].mxu1 }
 0x8dc   : > { %v2630_v40 = vmax.f32 %v2623_v32, 0.0  ;;  %v2625_v41 = vpop.f32.mrb[17].mxu1 }
 0x8dd   : > { %v2631_v50 = vmax.f32 %v2625_v41, 0.0  ;;  %v2627_v51 = vpop.f32.mrb[18].mxu1 }
 0x8de   : > { %v2628_v52 = vpop.f32.mrb[19].mxu1  ;;  %v2632_v54 = vpack.c.bf16 %v2630_v40, %v2630_v40 }
 0x8df   : > { %v2633_v53 = vpack.c.bf16 %v2631_v50, %v2631_v50 }
 0x8e1   : > { %2794 = vmatprep.mubr.bf16.mxu1 %v2633_v53 }
 0x8e2   : > { %2795 = vmatmul.mubr.bf16.vlgmr.msra.gmra.mrb[20].mxu1 %v2632_v54 }
 0x8e3   : > { %4221 = shalt.err (!%p4218_p3)
}
 0x8e4   : > { %s4222_s0 = scalar_lea.hbm %s5161_s16, 8192  ;;  %s4226_s4 = scalar_lea.hbm %s5358_s25, 16384 }
 0x8e5   : > { %p4223_p12 = scmp.ne.s32.totalorder %s5161_s16, %s4222_s0  ;;  %p4227_p0 = scmp.lt.u32.totalorder %s5161_s16, %s5358_s25 }
 0x8e6   : > { %p4228_p7 = scmp.lt.u32.totalorder %s4226_s4, %s4222_s0  ;;  %p4230_p6 = scmp.lt.u32.totalorder %s4222_s0, %s5161_s16 }
 0x8e7   : > { %p4224_p1 = pnand %p4223_p12, %p5359_p10 }
 0x8e8   : > { %p4229_p2 = por %p4228_p7, %p4227_p0 }
 0x8e9   : > { %p4225_p13 = pneg %p4224_p1 }
 0x8ea   : > { %p4231_p5 = por %p4230_p6, %p4229_p2 }
 0x8ec   : > { %p4232_p9 = pnand %p4231_p5, %p4225_p13 }
 0x8ee   : > { %4235 = shalt.err (!%p4232_p9)
}
 0x8ef   : > { %s4402_s15 = smov 256   ;;  %s4403_s11 = smov 16  }
 0x8f0   : > { %3478 = dma.vmem_to_hbm [thread:$0]  (%p5359_p10), %s5165_s29, 8192, %s5161_s16, %s5173_s28, %s4402_s15, %s4402_s15, %s4403_s11  }
 0x8f1   : > { %s5360_s4 = sld [smem:[#allocation39_spill]]  ;;  %s2810_s20 = scalar_lea.sflag [#allocation4], %s4801_s17 }
 0x8f2   : > { %s4236_s18 = scalar_lea.vmem %s2840_s3, 256  ;;  %s4404_s1 = smov [#allocation17]  }
 0x8f3   : > { %p4237_p4 = scmp.ne.s32.totalorder %s2840_s3, %s4236_s18  ;;  %s4240_s5 = sshll.u32 %s4404_s1, 4  ;;  %s4241_s5 = int_to_ptr.vmem [resolvable:$false] %s4240_s5 }
 0x8f4   : > { %s4242_s6 = scalar_lea.vmem %s4241_s5, 512  ;;  %p4243_p3 = scmp.lt.s32.totalorder %s2840_s3, %s4241_s5 }
 0x8f5   : > { %p4238_p8 = pnand %p4237_p4, %p5359_p10  ;;  %p4244_p12 = scmp.lt.s32.totalorder %s4242_s6, %s4236_s18 }
 0x8f7   : > { %s5202_s0 = scalar_lea.hbm %s5360_s4, %s3420_s19  ;;  %p4239_p11 = pneg %p4238_p8 }
 0x8f8   : > { %p4245_p1 = por %p4244_p12, %p4243_p3 }
 0x8fa   : > { %p4246_p13 = pnand %p4245_p1, %p4239_p11 }
 0x8fc   : > { %4249 = shalt.err (!%p4246_p13)
}
 0x8fd   : > { %s4250_s13 = scalar_lea.hbm %s5202_s0, 256  ;;  %s4254_s1 = scalar_lea.hbm %s5360_s4, 512 }
 0x8fe   : > { %p4251_p0 = scmp.ne.s32.totalorder %s5202_s0, %s4250_s13  ;;  %p4255_p6 = scmp.lt.u32.totalorder %s5202_s0, %s5360_s4 }
 0x8ff   : > { %p4256_p5 = scmp.lt.u32.totalorder %s4254_s1, %s4250_s13  ;;  %p4258_p4 = scmp.lt.u32.totalorder %s4250_s13, %s5202_s0 }
 0x900   : > { %p4252_p7 = pnand %p4251_p0, %p5359_p10 }
 0x901   : > { %p4257_p9 = por %p4256_p5, %p4255_p6 }
 0x902   : > { %p4253_p2 = pneg %p4252_p7 }
 0x903   : > { %p4259_p8 = por %p4258_p4, %p4257_p9 }
 0x905   : > { %p4260_p11 = pnand %p4259_p8, %p4253_p2 }
 0x907   : > { %4263 = shalt.err (!%p4260_p11)
}
 0x908   : > { %3477 = dma.vmem_to_hbm [thread:$0]  (%p5359_p10), %s2840_s3, 256, %s5202_s0, %s2810_s20  }
 0x909   : > { %s5361_s9 = sld [smem:[#allocation41_spill]]  ;;  %s4264_s18 = scalar_lea.vmem %s5153_s26, 256 }
 0x90a   : > { %p4265_p3 = scmp.ne.s32.totalorder %s5153_s26, %s4264_s18  ;;  %s4405_s13 = smov [#allocation20]  }
 0x90b   : > { %s4268_s16 = sshll.u32 %s4405_s13, 4  ;;  %s4269_s16 = int_to_ptr.vmem [resolvable:$false] %s4268_s16 }
 0x90c   : > { %p4266_p12 = pnand %p4265_p3, %p5359_p10  ;;  %s4270_s29 = scalar_lea.vmem %s4269_s16, 512 }
 0x90d   : > { %p4271_p13 = scmp.lt.s32.totalorder %s5153_s26, %s4269_s16  ;;  %p4272_p0 = scmp.lt.s32.totalorder %s4270_s29, %s4264_s18 }
 0x90e   : > { %p4267_p1 = pneg %p4266_p12 }
 0x90f   : > { %s2867_s2 = scalar_lea.hbm %s5361_s9, %s3420_s19  ;;  %p4273_p7 = por %p4272_p0, %p4271_p13 }
 0x911   : > { %p4274_p2 = pnand %p4273_p7, %p4267_p1 }
 0x913   : > { %4277 = shalt.err (!%p4274_p2)
}
 0x914   : > { %s4278_s3 = scalar_lea.hbm %s2867_s2, 256  ;;  %s4282_s20 = scalar_lea.hbm %s5361_s9, 512 }
 0x915   : > { %p4279_p6 = scmp.ne.s32.totalorder %s2867_s2, %s4278_s3  ;;  %p4283_p4 = scmp.lt.u32.totalorder %s2867_s2, %s5361_s9 }
 0x916   : > { %p4284_p8 = scmp.lt.u32.totalorder %s4282_s20, %s4278_s3  ;;  %p4286_p3 = scmp.lt.u32.totalorder %s4278_s3, %s2867_s2 }
 0x917   : > { %p4280_p5 = pnand %p4279_p6, %p5359_p10 }
 0x918   : > { %p4285_p11 = por %p4284_p8, %p4283_p4 }
 0x919   : > { %p4281_p9 = pneg %p4280_p5 }
 0x91a   : > { %p4287_p12 = por %p4286_p3, %p4285_p11 }
 0x91c   : > { %p4288_p1 = pnand %p4287_p12, %p4281_p9 }
 0x91e   : > { %4291 = shalt.err (!%p4288_p1)
}
 0x91f   : > { %3479 = dma.vmem_to_hbm [thread:$0]  (%p5359_p10), %s5153_s26, 256, %s2867_s2, %s5173_s28  }
 0x920   : > { %s3163_s5 = sshll.u32 %s4801_s17, 3  ;;  %s3415_s6 = sshll.u32 %s4493_s27, 7 }
 0x921   : > { %s598_s11 = scalar_lea.vmem [#allocation21], %s3163_s5  ;;  %s5362_s29 = sld [smem:[#allocation42_spill]] }
 0x922   : > { %s2882_s18 = sshll.u32 %s598_s11, 4  ;;  %s2825_s28 = scalar_lea.sflag [#allocation22], %s4801_s17  ;;  %s5253_s18 = int_to_ptr.vmem [resolvable:$true] %s2882_s18 }
 0x923   : > { %s4292_s2 = scalar_lea.vmem %s5253_s18, 128  ;;  %s4406_s27 = smov [#allocation21]  }
 0x924   : > { %p4293_p13 = scmp.ne.s32.totalorder %s5253_s18, %s4292_s2  ;;  %s4296_s3 = sshll.u32 %s4406_s27, 4  ;;  %s4297_s3 = int_to_ptr.vmem [resolvable:$false] %s4296_s3 }
 0x925   : > { %s4298_s19 = scalar_lea.vmem %s4297_s3, 256  ;;  %p4299_p2 = scmp.lt.s32.totalorder %s5253_s18, %s4297_s3 }
 0x926   : > { %p4294_p0 = pnand %p4293_p13, %p5359_p10  ;;  %p4300_p6 = scmp.lt.s32.totalorder %s4298_s19, %s4292_s2 }
 0x927   : > { %s5251_s26 = scalar_lea.hbm %s5362_s29, %s3415_s6 }
 0x928   : > { %p4295_p7 = pneg %p4294_p0  ;;  %p4301_p5 = por %p4300_p6, %p4299_p2 }
 0x92a   : > { %p4302_p9 = pnand %p4301_p5, %p4295_p7 }
 0x9b5   : > { %v3439_v10 = vpop.f32.mrb[20].mxu1 }
 0x9b6   : > { %v3440_v11 = vpop.f32.mrb[21].mxu1 }
 0x9b7   : > { %v3441_v12 = vadd.f32 %v3440_v11, %v3439_v10  ;;  %v3442_v13 = vpop.f32.mrb[22].mxu1 }
 0x9b8   : > { %v3443_v14 = vpop.f32.mrb[23].mxu1 }
 0x9b9   : > { %v3404_v15 = vmul.f32 -1.442695, %v3441_v12 }
 0x9bb   : > { %3946 = vpow2.f32 %v3404_v15 }
 0x9c5   : > { %v3947_v16 = vpop.eup %3946 }
 0x9c6   : > { %v2805_v17 = vadd.f32 1.0, %v3947_v16 }
 0x9c8   : > { %3948 = vrcp.f32 %v2805_v17 }
 0x9d2   : > { %v3949_v18 = vpop.eup %3948 }
 0x9d3   : > { %2808 = vst [vmem:[%s598_s11] sm:$0xff] %v3949_v18 }
 0x9d4   : > { %4305 = shalt.err (!%p4302_p9)
}
 0x9d5   : > { %s4306_s17 = scalar_lea.hbm %s5251_s26, 128  ;;  %s4310_s1 = scalar_lea.hbm %s5362_s29, 256 }
 0x9d6   : > { %p4307_p4 = scmp.ne.s32.totalorder %s5251_s26, %s4306_s17  ;;  %p4311_p3 = scmp.lt.u32.totalorder %s5251_s26, %s5362_s29 }
 0x9d7   : > { %p4312_p12 = scmp.lt.u32.totalorder %s4310_s1, %s4306_s17  ;;  %p4314_p13 = scmp.lt.u32.totalorder %s4306_s17, %s5251_s26 }
 0x9d8   : > { %p4308_p8 = pnand %p4307_p4, %p5359_p10 }
 0x9d9   : > { %p4313_p1 = por %p4312_p12, %p4311_p3 }
 0x9da   : > { %p4309_p11 = pneg %p4308_p8 }
 0x9db   : > { %p4315_p0 = por %p4314_p13, %p4313_p1 }
 0x9dd   : > { %p4316_p7 = pnand %p4315_p0, %p4309_p11 }
 0x9df   : > { %4319 = shalt.err (!%p4316_p7)
}
 0x9e0   : > { %3480 = dma.vmem_to_hbm [thread:$0]  (%p5359_p10), %s5253_s18, 128, %s5251_s26, %s2825_s28  }
 0x9e1 PF: > { %s2894_s6 = sand.u32 1, %s4374_s21   ;;  %p5363_p2 = scmp.ne.s32.totalorder %s5342_s30, 0 }
 0x9e2   : > { %p5364_p6 = scmp.ge.s32.totalorder %s4386_s24, 2  ;;  %s2895_s11 = scalar_lea.sflag [#allocation4], %s2894_s6 }
 0x9e4   : > { %p3515_p5 = pnand %p5364_p6, %p5363_p2 }
 0x9e6   : > { %4361 = dma.done.wait (!%p3515_p5), %s2895_s11, 256  }
 0x9e7   : > { %4363 = vsyncadd (!%p3515_p5), %s2895_s11, 4294967040  ;;  %s5365_s13 = sadd.s32 4294967294, %s4386_s24  }
 0x9e8   : > { %s2903_s16 = sand.u32 1, %s5365_s13  }
 0x9e9   : > { %s2904_s2 = scalar_lea.sflag [#allocation19], %s2903_s16 }
 0x9ea   : > { %4365 = dma.done.wait (!%p3515_p5), %s2904_s2, 8448  }
 0x9eb   : > { %4367 = vsyncadd (!%p3515_p5), %s2904_s2, 4294958848  ;;  %s2922_s12 = scalar_lea.sflag [#allocation22], %s2894_s6 }
 0x9ec   : > { %4369 = dma.done.wait (!%p3515_p5), %s2922_s12, 128  }
 0x9ed   : > { %4371 = vsyncadd (!%p3515_p5), %s2922_s12, 4294967168  ;;  %p38_p10 = scmp.ge.s32.totalorder %s4684_s10, 4   ;;  %s5366_s21 = smov %s4378_s22 }
 0x9ee   : > { %s5367_s22 = smov %s4382_s23  ;;  %s5368_s23 = smov %s4696_s14 }
 0x9ef   : > { %s5369_s24 = smov %s4684_s10  ;;  %40 = sbr.rel (!%p38_p10) target bundleno = 26 (0x1a), region = 191 }
 0x9f6   :  { %2927 = vsyncpa [#allocation3], 1 }
 0x9f7   :  { %2929 = vsyncpa [#allocation3 + $0x1], 1 }
 0x9f8   :  { %2930 = vsyncpa [#allocation6], 1 }
 0x9f9   :  { %2932 = vsyncpa [#allocation6 + $0x1], 1 }
 0x9fa   :  { %2933 = vsyncpa [#allocation9], 1 }
 0x9fb   :  { %2934 = vsyncpa [#allocation12], 1 }
 0x9fc   :  { %2935 = vsyncpa [#allocation15], 1 }
 0x9fd   :  { %2936 = vsyncpa [#allocation4], 1 }
 0x9fe   :  { %2938 = vsyncpa [#allocation4 + $0x1], 1 }
 0x9ff   :  { %2939 = vsyncpa [#allocation19], 1 }
 0xa00   :  { %2941 = vsyncpa [#allocation19 + $0x1], 1 }
 0xa01   :  { %2942 = vsyncpa [#allocation22], 1 }
 0xa02   :  { %2944 = vsyncpa [#allocation22 + $0x1], 1 }

</bundles_post_ra>
